<compile_context>
chip_gen: v6e
topology: v6e:2x2x1
jax: 0.10.0
libtpu: 0.0.40
codegen_flags: <defaults>
</compile_context>

<pallas_src>
import functools

import jax
import jax.numpy as jnp
from jax.experimental import pallas as pl
from jax.experimental.pallas import tpu as pltpu


# ----------------------------------------------------------------------------
# Fused Pallas kernel: conv1 + ReLU + conv2 + log_softmax
# ----------------------------------------------------------------------------
def _net_kernel(lhat_ref, x_ref, w1_ref, b1_ref, w2_ref, b2_ref, o_ref,
                tstack_ref, *, num_k, slab, f_pad, num_classes):
    """Whole-graph fused forward.

    lhat_ref:   [N, N]               bf16, scaled Laplacian (loaded once)
    x_ref:      [N, f_pad]           f32, node features zero-padded to 128 lanes
    w{1,2}_ref: [stack_rows, f_pad]  bf16, per-order weights packed at `slab`
                                     rows per Chebyshev order
    b{1,2}_ref: [1, f_pad]           f32
    o_ref:      [N, f_pad]           f32 (valid classes in the first lanes)
    tstack_ref: [N, stack_rows]      bf16 scratch holding packed T_0..T_{K-1}
    """
    lhat = lhat_ref[...]  # resident in VMEM once, reused by both layers

    # Zero the packed T-stack once: the padded tail lanes (>= num_k*slab) must
    # be zero so uninitialized VMEM cannot leak NaNs/garbage into the stacked
    # projection (their weight rows are zero, but 0 * NaN = NaN).
    tstack_ref[...] = jnp.zeros_like(tstack_ref)

    def cheb_layer(x0, w_ref, b_ref):
        # Chebyshev recursion in f32; L@T matmuls take bf16 operands and
        # accumulate in f32.  Each T_k is packed (bf16, true slab width) into
        # the stack for a single deep projection at the end.
        tx_prev = x0
        tstack_ref[:, 0:slab] = tx_prev[:, :slab].astype(jnp.bfloat16)
        if num_k > 1:
            tx_cur = jnp.dot(lhat, tx_prev.astype(jnp.bfloat16),
                             preferred_element_type=jnp.float32)
            tstack_ref[:, slab:2 * slab] = tx_cur[:, :slab].astype(jnp.bfloat16)
            for k in range(2, num_k):
                tx_new = 2.0 * jnp.dot(lhat, tx_cur.astype(jnp.bfloat16),
                                       preferred_element_type=jnp.float32) - tx_prev
                tstack_ref[:, k * slab:(k + 1) * slab] = (
                    tx_new[:, :slab].astype(jnp.bfloat16))
                tx_prev, tx_cur = tx_cur, tx_new
        # Single stacked projection: one deep bf16 MXU contraction over all
        # K orders, accumulated in f32.
        z = jnp.dot(tstack_ref[...], w_ref[...],
                    preferred_element_type=jnp.float32)
        return z + b_ref[...]

    # ---- layer 1: ChebConv -> ReLU ----
    h = jnp.maximum(cheb_layer(x_ref[...], w1_ref, b1_ref), 0.0)
    # F.dropout(x, training=self.training): identity at inference.
    # TODO(synk): training-mode dropout (pltpu.prng_*) not implemented.

    # ---- layer 2: ChebConv -> log_softmax over the valid class lanes ----
    z = cheb_layer(h, w2_ref, b2_ref)
    col = jax.lax.broadcasted_iota(jnp.int32, z.shape, 1)
    valid = col < num_classes
    m = jnp.max(jnp.where(valid, z, -jnp.inf), axis=1, keepdims=True)
    s = z - m
    lse = jnp.log(jnp.sum(jnp.where(valid, jnp.exp(s), 0.0),
                          axis=1, keepdims=True))
    o_ref[...] = (s - lse).astype(o_ref.dtype)


def net_forward(params, x, lhat, *, f_pad=128):
    """Fused forward: one pallas_call for both ChebConv layers."""
    (w1, b1), (w2, b2) = params
    n, f_in = x.shape
    num_k, _, hidden = w1.shape
    num_classes = w2.shape[2]
    assert w2.shape[0] == num_k and w2.shape[1] == hidden
    assert max(f_in, hidden, num_classes) <= f_pad

    # True per-order slab width: every nonzero lane of every T_k (both layers)
    # lives in the first `slab` lanes, because padded feature lanes stay zero
    # through the recursion and ReLU.
    slab = max(f_in, hidden)
    slab = ((slab + 7) // 8) * 8
    assert slab <= f_pad
    stack_rows = pl.cdiv(num_k * slab, 128) * 128   # 256 for K=15, slab=16

    # Host-side padding / stacking (free layout plumbing).
    x_p = jnp.zeros((n, f_pad), jnp.float32).at[:, :f_in].set(x)
    lhat_b = lhat.astype(jnp.bfloat16)

    def stack_w(w):
        k, fi, fo = w.shape
        wp = jnp.zeros((k, slab, f_pad), jnp.float32).at[:, :fi, :fo].set(w)
        wp = wp.reshape(k * slab, f_pad)
        full = jnp.zeros((stack_rows, f_pad), jnp.float32).at[:k * slab].set(wp)
        return full.astype(jnp.bfloat16)

    def pad_b(b):
        return jnp.zeros((1, f_pad), jnp.float32).at[:, :b.shape[1]].set(b)

    w1s, w2s = stack_w(w1), stack_w(w2)
    b1p, b2p = pad_b(b1), pad_b(b2)

    # VMEM budget (bytes): actual residency + live f32 recursion temporaries
    # + headroom, capped below the physical per-core VMEM of this generation
    # (64 MiB on v7x, 128 MiB on v5e/v6e).
    resident = (lhat_b.size * 2 + x_p.size * 4
                + (w1s.size + w2s.size) * 2
                + (b1p.size + b2p.size) * 4
                + n * f_pad * 4                 # output
                + n * stack_rows * 2)           # packed bf16 T-stack scratch
    temporaries = 6 * n * f_pad * 4             # tx_prev / tx_cur / tx_new / h
    try:
        vmem_cap = int(pltpu.get_tpu_info().vmem_capacity_bytes)
    except Exception:
        vmem_cap = 64 << 20                     # conservative: v7x per-TC
    vmem_limit = min(int(resident + temporaries) + (8 << 20),
                     vmem_cap - (8 << 20))
    vmem_limit = max(vmem_limit, 16 << 20)

    flops_per_layer = (2 * (num_k - 1) * n * n * f_pad      # recursion L @ T_k
                       + 2 * n * stack_rows * f_pad)        # packed projection
    cost = pl.CostEstimate(
        flops=2 * flops_per_layer,
        transcendentals=n * f_pad + n,          # exp + log of log_softmax
        bytes_accessed=int(resident))

    kernel = functools.partial(_net_kernel, num_k=num_k, slab=slab,
                               f_pad=f_pad, num_classes=num_classes)

    out_p = pl.pallas_call(
        kernel,
        out_shape=jax.ShapeDtypeStruct((n, f_pad), jnp.float32),
        in_specs=[pl.BlockSpec(memory_space=pltpu.MemorySpace.VMEM)] * 6,
        out_specs=pl.BlockSpec(memory_space=pltpu.MemorySpace.VMEM),
        scratch_shapes=[pltpu.VMEM((n, stack_rows), jnp.bfloat16)],
        compiler_params=pltpu.CompilerParams(vmem_limit_bytes=vmem_limit),
        cost_estimate=cost,
    )(lhat_b, x_p, w1s, b1p, w2s, b2p)

    # TODO(synk): v7x 2-TensorCore row-split of L_hat (core_map + per-step
    # half-T exchange) and async row-slab streaming of L_hat to hide its
    # cold-start DMA; whole-L residency remains the fastest regime up to
    # N ~5k (v7x) / ~7k (v5e/v6e) with the packed bf16 stack above.
    return out_p[:, :num_classes]


# ----------------------------------------------------------------------------
# Glue (plain JAX): graph normalization + parameter init
# ----------------------------------------------------------------------------
def scaled_laplacian(edge_index, edge_weight, num_nodes):
    """Dense L_hat = 2/lambda_max * L_sym - I with lambda_max=2.0
    => L_hat = -D^{-1/2} A D^{-1/2}  (PyG ChebConv default sym normalization)."""
    a = jnp.zeros((num_nodes, num_nodes), jnp.float32)
    a = a.at[edge_index[0], edge_index[1]].add(edge_weight)
    deg = a.sum(axis=1)
    d_inv_sqrt = jnp.where(deg > 0, 1.0 / jnp.sqrt(deg), 0.0)
    return -(d_inv_sqrt[:, None] * a * d_inv_sqrt[None, :])


def init_cheb_params(key, k, f_in, f_out):
    wkey, _ = jax.random.split(key)
    scale = jnp.sqrt(2.0 / (f_in + f_out))
    weight = scale * jax.random.normal(wkey, (k, f_in, f_out), jnp.float32)
    bias = jnp.zeros((1, f_out), jnp.float32)
    return weight, bias


# ----------------------------------------------------------------------------
# Pure-JAX reference (same arithmetic as the kernel: bf16 L@T recursion
# matmuls with f32 accumulate, bf16 per-order projection with f32 accumulate)
# ----------------------------------------------------------------------------
def _cheb_ref(lhat_bf, x, w, b):
    k = w.shape[0]
    tx_prev = x
    acc = jnp.dot(tx_prev.astype(jnp.bfloat16), w[0].astype(jnp.bfloat16),
                  preferred_element_type=jnp.float32)
    if k > 1:
        tx_cur = jnp.dot(lhat_bf, tx_prev.astype(jnp.bfloat16),
                         preferred_element_type=jnp.float32)
        acc = acc + jnp.dot(tx_cur.astype(jnp.bfloat16),
                            w[1].astype(jnp.bfloat16),
                            preferred_element_type=jnp.float32)
        for i in range(2, k):
            tx_new = 2.0 * jnp.dot(lhat_bf, tx_cur.astype(jnp.bfloat16),
                                   preferred_element_type=jnp.float32) - tx_prev
            acc = acc + jnp.dot(tx_new.astype(jnp.bfloat16),
                                w[i].astype(jnp.bfloat16),
                                preferred_element_type=jnp.float32)
            tx_prev, tx_cur = tx_cur, tx_new
    return acc + b


def _ref_forward(params, x, lhat):
    (w1, b1), (w2, b2) = params
    lhat_bf = lhat.astype(jnp.bfloat16)
    h = jnp.maximum(_cheb_ref(lhat_bf, x, w1, b1), 0.0)
    z = _cheb_ref(lhat_bf, h, w2, b2)
    return jax.nn.log_softmax(z, axis=1)


# ----------------------------------------------------------------------------
if __name__ == "__main__":
    # Small synthetic graph (stand-in for `data`): N nodes, ring topology.
    N = 16            # num nodes
    NUM_FEATURES = 8  # data.num_features
    HIDDEN = 16
    NUM_CLASSES = 4   # data.num_classes
    K = 15            # Chebyshev order

    key = jax.random.PRNGKey(0)
    kx, kw, k1, k2 = jax.random.split(key, 4)

    # node features
    x = jax.random.normal(kx, (N, NUM_FEATURES), jnp.float32)

    # bidirectional ring edges with random positive weights
    src = jnp.arange(N, dtype=jnp.int32)
    dst = (src + 1) % N
    edge_index = jnp.stack(
        [jnp.concatenate([src, dst]), jnp.concatenate([dst, src])], axis=0)
    edge_weight = jax.random.uniform(
        kw, (edge_index.shape[1],), jnp.float32, minval=0.5, maxval=1.5)

    lhat = scaled_laplacian(edge_index, edge_weight, N)

    params = (
        init_cheb_params(k1, K, NUM_FEATURES, HIDDEN),
        init_cheb_params(k2, K, HIDDEN, NUM_CLASSES),
    )

    out = jax.block_until_ready(net_forward(params, x, lhat))
    ref = _ref_forward(params, x, lhat)

    assert out.shape == (N, NUM_CLASSES)
    assert jnp.allclose(out, ref, atol=2e-3, rtol=2e-3), "mismatch vs reference"
    print("KERNEL_OK")
</pallas_src>

<mosaic_0001>
module attributes {stable_mosaic.version = 11 : i64} {
  func.func @_net_kernel(%arg0: memref<16x16xbf16, #tpu.memory_space<vmem>>, %arg1: memref<16x128xf32, #tpu.memory_space<vmem>>, %arg2: memref<256x128xbf16, #tpu.memory_space<vmem>>, %arg3: memref<1x128xf32, #tpu.memory_space<vmem>>, %arg4: memref<256x128xbf16, #tpu.memory_space<vmem>>, %arg5: memref<1x128xf32, #tpu.memory_space<vmem>>, %arg6: memref<16x128xf32, #tpu.memory_space<vmem>>, %arg7: memref<16x256xbf16, #tpu.memory_space<vmem>>) attributes {dimension_semantics = [], scalar_prefetch = 0 : i64, scratch_operands = 1 : i64, tpu.core_type = #tpu.core_type<tc>} {
    %c0 = arith.constant 0 : index
    %c0_0 = arith.constant 0 : index
    %0 = vector.load %arg0[%c0, %c0_0] : memref<16x16xbf16, #tpu.memory_space<vmem>>, vector<16x16xbf16>
    %cst = arith.constant 0.000000e+00 : bf16
    %1 = vector.broadcast %cst : bf16 to vector<16x256xbf16>
    %c0_1 = arith.constant 0 : index
    %c0_2 = arith.constant 0 : index
    %2 = vector.load %arg7[%c0_1, %c0_2] : memref<16x256xbf16, #tpu.memory_space<vmem>>, vector<16x256xbf16>
    tpu.vector_store %arg7[%c0_1, %c0_2], %1 {strides = array<i32>} : memref<16x256xbf16, #tpu.memory_space<vmem>>, vector<16x256xbf16>,
    %c0_3 = arith.constant 0 : index
    %c0_4 = arith.constant 0 : index
    %3 = vector.load %arg1[%c0_3, %c0_4] : memref<16x128xf32, #tpu.memory_space<vmem>>, vector<16x128xf32>
    %4 = vector.extract_strided_slice %3 {offsets = [0, 0], sizes = [16, 16], strides = [1, 1]} : vector<16x128xf32> to vector<16x16xf32>
    %5 = arith.truncf %4 : vector<16x16xf32> to vector<16x16xbf16>
    %c0_5 = arith.constant 0 : index
    %c0_6 = arith.constant 0 : index
    %6 = vector.load %arg7[%c0_5, %c0_6] : memref<16x256xbf16, #tpu.memory_space<vmem>>, vector<16x16xbf16>
    tpu.vector_store %arg7[%c0_5, %c0_6], %5 {strides = array<i32>} : memref<16x256xbf16, #tpu.memory_space<vmem>>, vector<16x16xbf16>,
    %7 = arith.truncf %3 : vector<16x128xf32> to vector<16x128xbf16>
    %cst_7 = arith.constant dense<0.000000e+00> : vector<16x128xf32>
    %8 = tpu.matmul %0, %7, %cst_7 {dimension_numbers = #tpu.dot_dimension_numbers<[1], [0], [0], [1], [0, 0, 1, 1], [], []>} : vector<16x16xbf16>, vector<16x128xbf16>, vector<16x128xf32> -> vector<16x128xf32>
    %9 = vector.extract_strided_slice %8 {offsets = [0, 0], sizes = [16, 16], strides = [1, 1]} : vector<16x128xf32> to vector<16x16xf32>
    %10 = arith.truncf %9 : vector<16x16xf32> to vector<16x16xbf16>
    %c0_8 = arith.constant 0 : index
    %c16 = arith.constant 16 : index
    %11 = vector.load %arg7[%c0_8, %c16] : memref<16x256xbf16, #tpu.memory_space<vmem>>, vector<16x16xbf16>
    tpu.vector_store %arg7[%c0_8, %c16], %10 {strides = array<i32>} : memref<16x256xbf16, #tpu.memory_space<vmem>>, vector<16x16xbf16>,
    %12 = arith.truncf %8 : vector<16x128xf32> to vector<16x128xbf16>
    %cst_9 = arith.constant dense<0.000000e+00> : vector<16x128xf32>
    %13 = tpu.matmul %0, %12, %cst_9 {dimension_numbers = #tpu.dot_dimension_numbers<[1], [0], [0], [1], [0, 0, 1, 1], [], []>} : vector<16x16xbf16>, vector<16x128xbf16>, vector<16x128xf32> -> vector<16x128xf32>
    %cst_10 = arith.constant 2.000000e+00 : f32
    %14 = vector.broadcast %cst_10 : f32 to vector<16x128xf32>
    %15 = arith.mulf %14, %13 : vector<16x128xf32>
    %16 = arith.subf %15, %3 : vector<16x128xf32>
    %17 = vector.extract_strided_slice %16 {offsets = [0, 0], sizes = [16, 16], strides = [1, 1]} : vector<16x128xf32> to vector<16x16xf32>
    %18 = arith.truncf %17 : vector<16x16xf32> to vector<16x16xbf16>
    %c0_11 = arith.constant 0 : index
    %c32 = arith.constant 32 : index
    %19 = vector.load %arg7[%c0_11, %c32] : memref<16x256xbf16, #tpu.memory_space<vmem>>, vector<16x16xbf16>
    tpu.vector_store %arg7[%c0_11, %c32], %18 {strides = array<i32>} : memref<16x256xbf16, #tpu.memory_space<vmem>>, vector<16x16xbf16>,
    %20 = arith.truncf %16 : vector<16x128xf32> to vector<16x128xbf16>
    %cst_12 = arith.constant dense<0.000000e+00> : vector<16x128xf32>
    %21 = tpu.matmul %0, %20, %cst_12 {dimension_numbers = #tpu.dot_dimension_numbers<[1], [0], [0], [1], [0, 0, 1, 1], [], []>} : vector<16x16xbf16>, vector<16x128xbf16>, vector<16x128xf32> -> vector<16x128xf32>
    %cst_13 = arith.constant 2.000000e+00 : f32
    %22 = vector.broadcast %cst_13 : f32 to vector<16x128xf32>
    %23 = arith.mulf %22, %21 : vector<16x128xf32>
    %24 = arith.subf %23, %8 : vector<16x128xf32>
    %25 = vector.extract_strided_slice %24 {offsets = [0, 0], sizes = [16, 16], strides = [1, 1]} : vector<16x128xf32> to vector<16x16xf32>
    %26 = arith.truncf %25 : vector<16x16xf32> to vector<16x16xbf16>
    %c0_14 = arith.constant 0 : index
    %c48 = arith.constant 48 : index
    %27 = vector.load %arg7[%c0_14, %c48] : memref<16x256xbf16, #tpu.memory_space<vmem>>, vector<16x16xbf16>
    tpu.vector_store %arg7[%c0_14, %c48], %26 {strides = array<i32>} : memref<16x256xbf16, #tpu.memory_space<vmem>>, vector<16x16xbf16>,
    %28 = arith.truncf %24 : vector<16x128xf32> to vector<16x128xbf16>
    %cst_15 = arith.constant dense<0.000000e+00> : vector<16x128xf32>
    %29 = tpu.matmul %0, %28, %cst_15 {dimension_numbers = #tpu.dot_dimension_numbers<[1], [0], [0], [1], [0, 0, 1, 1], [], []>} : vector<16x16xbf16>, vector<16x128xbf16>, vector<16x128xf32> -> vector<16x128xf32>
    %cst_16 = arith.constant 2.000000e+00 : f32
    %30 = vector.broadcast %cst_16 : f32 to vector<16x128xf32>
    %31 = arith.mulf %30, %29 : vector<16x128xf32>
    %32 = arith.subf %31, %16 : vector<16x128xf32>
    %33 = vector.extract_strided_slice %32 {offsets = [0, 0], sizes = [16, 16], strides = [1, 1]} : vector<16x128xf32> to vector<16x16xf32>
    %34 = arith.truncf %33 : vector<16x16xf32> to vector<16x16xbf16>
    %c0_17 = arith.constant 0 : index
    %c64 = arith.constant 64 : index
    %35 = vector.load %arg7[%c0_17, %c64] : memref<16x256xbf16, #tpu.memory_space<vmem>>, vector<16x16xbf16>
    tpu.vector_store %arg7[%c0_17, %c64], %34 {strides = array<i32>} : memref<16x256xbf16, #tpu.memory_space<vmem>>, vector<16x16xbf16>,
    %36 = arith.truncf %32 : vector<16x128xf32> to vector<16x128xbf16>
    %cst_18 = arith.constant dense<0.000000e+00> : vector<16x128xf32>
    %37 = tpu.matmul %0, %36, %cst_18 {dimension_numbers = #tpu.dot_dimension_numbers<[1], [0], [0], [1], [0, 0, 1, 1], [], []>} : vector<16x16xbf16>, vector<16x128xbf16>, vector<16x128xf32> -> vector<16x128xf32>
    %cst_19 = arith.constant 2.000000e+00 : f32
    %38 = vector.broadcast %cst_19 : f32 to vector<16x128xf32>
    %39 = arith.mulf %38, %37 : vector<16x128xf32>
    %40 = arith.subf %39, %24 : vector<16x128xf32>
    %41 = vector.extract_strided_slice %40 {offsets = [0, 0], sizes = [16, 16], strides = [1, 1]} : vector<16x128xf32> to vector<16x16xf32>
    %42 = arith.truncf %41 : vector<16x16xf32> to vector<16x16xbf16>
    %c0_20 = arith.constant 0 : index
    %c80 = arith.constant 80 : index
    %43 = vector.load %arg7[%c0_20, %c80] : memref<16x256xbf16, #tpu.memory_space<vmem>>, vector<16x16xbf16>
    tpu.vector_store %arg7[%c0_20, %c80], %42 {strides = array<i32>} : memref<16x256xbf16, #tpu.memory_space<vmem>>, vector<16x16xbf16>,
    %44 = arith.truncf %40 : vector<16x128xf32> to vector<16x128xbf16>
    %cst_21 = arith.constant dense<0.000000e+00> : vector<16x128xf32>
    %45 = tpu.matmul %0, %44, %cst_21 {dimension_numbers = #tpu.dot_dimension_numbers<[1], [0], [0], [1], [0, 0, 1, 1], [], []>} : vector<16x16xbf16>, vector<16x128xbf16>, vector<16x128xf32> -> vector<16x128xf32>
    %cst_22 = arith.constant 2.000000e+00 : f32
    %46 = vector.broadcast %cst_22 : f32 to vector<16x128xf32>
    %47 = arith.mulf %46, %45 : vector<16x128xf32>
    %48 = arith.subf %47, %32 : vector<16x128xf32>
    %49 = vector.extract_strided_slice %48 {offsets = [0, 0], sizes = [16, 16], strides = [1, 1]} : vector<16x128xf32> to vector<16x16xf32>
    %50 = arith.truncf %49 : vector<16x16xf32> to vector<16x16xbf16>
    %c0_23 = arith.constant 0 : index
    %c96 = arith.constant 96 : index
    %51 = vector.load %arg7[%c0_23, %c96] : memref<16x256xbf16, #tpu.memory_space<vmem>>, vector<16x16xbf16>
    tpu.vector_store %arg7[%c0_23, %c96], %50 {strides = array<i32>} : memref<16x256xbf16, #tpu.memory_space<vmem>>, vector<16x16xbf16>,
    %52 = arith.truncf %48 : vector<16x128xf32> to vector<16x128xbf16>
    %cst_24 = arith.constant dense<0.000000e+00> : vector<16x128xf32>
    %53 = tpu.matmul %0, %52, %cst_24 {dimension_numbers = #tpu.dot_dimension_numbers<[1], [0], [0], [1], [0, 0, 1, 1], [], []>} : vector<16x16xbf16>, vector<16x128xbf16>, vector<16x128xf32> -> vector<16x128xf32>
    %cst_25 = arith.constant 2.000000e+00 : f32
    %54 = vector.broadcast %cst_25 : f32 to vector<16x128xf32>
    %55 = arith.mulf %54, %53 : vector<16x128xf32>
    %56 = arith.subf %55, %40 : vector<16x128xf32>
    %57 = vector.extract_strided_slice %56 {offsets = [0, 0], sizes = [16, 16], strides = [1, 1]} : vector<16x128xf32> to vector<16x16xf32>
    %58 = arith.truncf %57 : vector<16x16xf32> to vector<16x16xbf16>
    %c0_26 = arith.constant 0 : index
    %c112 = arith.constant 112 : index
    %59 = vector.load %arg7[%c0_26, %c112] : memref<16x256xbf16, #tpu.memory_space<vmem>>, vector<16x16xbf16>
    tpu.vector_store %arg7[%c0_26, %c112], %58 {strides = array<i32>} : memref<16x256xbf16, #tpu.memory_space<vmem>>, vector<16x16xbf16>,
    %60 = arith.truncf %56 : vector<16x128xf32> to vector<16x128xbf16>
    %cst_27 = arith.constant dense<0.000000e+00> : vector<16x128xf32>
    %61 = tpu.matmul %0, %60, %cst_27 {dimension_numbers = #tpu.dot_dimension_numbers<[1], [0], [0], [1], [0, 0, 1, 1], [], []>} : vector<16x16xbf16>, vector<16x128xbf16>, vector<16x128xf32> -> vector<16x128xf32>
    %cst_28 = arith.constant 2.000000e+00 : f32
    %62 = vector.broadcast %cst_28 : f32 to vector<16x128xf32>
    %63 = arith.mulf %62, %61 : vector<16x128xf32>
    %64 = arith.subf %63, %48 : vector<16x128xf32>
    %65 = vector.extract_strided_slice %64 {offsets = [0, 0], sizes = [16, 16], strides = [1, 1]} : vector<16x128xf32> to vector<16x16xf32>
    %66 = arith.truncf %65 : vector<16x16xf32> to vector<16x16xbf16>
    %c0_29 = arith.constant 0 : index
    %c128 = arith.constant 128 : index
    %67 = vector.load %arg7[%c0_29, %c128] : memref<16x256xbf16, #tpu.memory_space<vmem>>, vector<16x16xbf16>
    tpu.vector_store %arg7[%c0_29, %c128], %66 {strides = array<i32>} : memref<16x256xbf16, #tpu.memory_space<vmem>>, vector<16x16xbf16>,
    %68 = arith.truncf %64 : vector<16x128xf32> to vector<16x128xbf16>
    %cst_30 = arith.constant dense<0.000000e+00> : vector<16x128xf32>
    %69 = tpu.matmul %0, %68, %cst_30 {dimension_numbers = #tpu.dot_dimension_numbers<[1], [0], [0], [1], [0, 0, 1, 1], [], []>} : vector<16x16xbf16>, vector<16x128xbf16>, vector<16x128xf32> -> vector<16x128xf32>
    %cst_31 = arith.constant 2.000000e+00 : f32
    %70 = vector.broadcast %cst_31 : f32 to vector<16x128xf32>
    %71 = arith.mulf %70, %69 : vector<16x128xf32>
    %72 = arith.subf %71, %56 : vector<16x128xf32>
    %73 = vector.extract_strided_slice %72 {offsets = [0, 0], sizes = [16, 16], strides = [1, 1]} : vector<16x128xf32> to vector<16x16xf32>
    %74 = arith.truncf %73 : vector<16x16xf32> to vector<16x16xbf16>
    %c0_32 = arith.constant 0 : index
    %c144 = arith.constant 144 : index
    %75 = vector.load %arg7[%c0_32, %c144] : memref<16x256xbf16, #tpu.memory_space<vmem>>, vector<16x16xbf16>
    tpu.vector_store %arg7[%c0_32, %c144], %74 {strides = array<i32>} : memref<16x256xbf16, #tpu.memory_space<vmem>>, vector<16x16xbf16>,
    %76 = arith.truncf %72 : vector<16x128xf32> to vector<16x128xbf16>
    %cst_33 = arith.constant dense<0.000000e+00> : vector<16x128xf32>
    %77 = tpu.matmul %0, %76, %cst_33 {dimension_numbers = #tpu.dot_dimension_numbers<[1], [0], [0], [1], [0, 0, 1, 1], [], []>} : vector<16x16xbf16>, vector<16x128xbf16>, vector<16x128xf32> -> vector<16x128xf32>
    %cst_34 = arith.constant 2.000000e+00 : f32
    %78 = vector.broadcast %cst_34 : f32 to vector<16x128xf32>
    %79 = arith.mulf %78, %77 : vector<16x128xf32>
    %80 = arith.subf %79, %64 : vector<16x128xf32>
    %81 = vector.extract_strided_slice %80 {offsets = [0, 0], sizes = [16, 16], strides = [1, 1]} : vector<16x128xf32> to vector<16x16xf32>
    %82 = arith.truncf %81 : vector<16x16xf32> to vector<16x16xbf16>
    %c0_35 = arith.constant 0 : index
    %c160 = arith.constant 160 : index
    %83 = vector.load %arg7[%c0_35, %c160] : memref<16x256xbf16, #tpu.memory_space<vmem>>, vector<16x16xbf16>
    tpu.vector_store %arg7[%c0_35, %c160], %82 {strides = array<i32>} : memref<16x256xbf16, #tpu.memory_space<vmem>>, vector<16x16xbf16>,
    %84 = arith.truncf %80 : vector<16x128xf32> to vector<16x128xbf16>
    %cst_36 = arith.constant dense<0.000000e+00> : vector<16x128xf32>
    %85 = tpu.matmul %0, %84, %cst_36 {dimension_numbers = #tpu.dot_dimension_numbers<[1], [0], [0], [1], [0, 0, 1, 1], [], []>} : vector<16x16xbf16>, vector<16x128xbf16>, vector<16x128xf32> -> vector<16x128xf32>
    %cst_37 = arith.constant 2.000000e+00 : f32
    %86 = vector.broadcast %cst_37 : f32 to vector<16x128xf32>
    %87 = arith.mulf %86, %85 : vector<16x128xf32>
    %88 = arith.subf %87, %72 : vector<16x128xf32>
    %89 = vector.extract_strided_slice %88 {offsets = [0, 0], sizes = [16, 16], strides = [1, 1]} : vector<16x128xf32> to vector<16x16xf32>
    %90 = arith.truncf %89 : vector<16x16xf32> to vector<16x16xbf16>
    %c0_38 = arith.constant 0 : index
    %c176 = arith.constant 176 : index
    %91 = vector.load %arg7[%c0_38, %c176] : memref<16x256xbf16, #tpu.memory_space<vmem>>, vector<16x16xbf16>
    tpu.vector_store %arg7[%c0_38, %c176], %90 {strides = array<i32>} : memref<16x256xbf16, #tpu.memory_space<vmem>>, vector<16x16xbf16>,
    %92 = arith.truncf %88 : vector<16x128xf32> to vector<16x128xbf16>
    %cst_39 = arith.constant dense<0.000000e+00> : vector<16x128xf32>
    %93 = tpu.matmul %0, %92, %cst_39 {dimension_numbers = #tpu.dot_dimension_numbers<[1], [0], [0], [1], [0, 0, 1, 1], [], []>} : vector<16x16xbf16>, vector<16x128xbf16>, vector<16x128xf32> -> vector<16x128xf32>
    %cst_40 = arith.constant 2.000000e+00 : f32
    %94 = vector.broadcast %cst_40 : f32 to vector<16x128xf32>
    %95 = arith.mulf %94, %93 : vector<16x128xf32>
    %96 = arith.subf %95, %80 : vector<16x128xf32>
    %97 = vector.extract_strided_slice %96 {offsets = [0, 0], sizes = [16, 16], strides = [1, 1]} : vector<16x128xf32> to vector<16x16xf32>
    %98 = arith.truncf %97 : vector<16x16xf32> to vector<16x16xbf16>
    %c0_41 = arith.constant 0 : index
    %c192 = arith.constant 192 : index
    %99 = vector.load %arg7[%c0_41, %c192] : memref<16x256xbf16, #tpu.memory_space<vmem>>, vector<16x16xbf16>
    tpu.vector_store %arg7[%c0_41, %c192], %98 {strides = array<i32>} : memref<16x256xbf16, #tpu.memory_space<vmem>>, vector<16x16xbf16>,
    %100 = arith.truncf %96 : vector<16x128xf32> to vector<16x128xbf16>
    %cst_42 = arith.constant dense<0.000000e+00> : vector<16x128xf32>
    %101 = tpu.matmul %0, %100, %cst_42 {dimension_numbers = #tpu.dot_dimension_numbers<[1], [0], [0], [1], [0, 0, 1, 1], [], []>} : vector<16x16xbf16>, vector<16x128xbf16>, vector<16x128xf32> -> vector<16x128xf32>
    %cst_43 = arith.constant 2.000000e+00 : f32
    %102 = vector.broadcast %cst_43 : f32 to vector<16x128xf32>
    %103 = arith.mulf %102, %101 : vector<16x128xf32>
    %104 = arith.subf %103, %88 : vector<16x128xf32>
    %105 = vector.extract_strided_slice %104 {offsets = [0, 0], sizes = [16, 16], strides = [1, 1]} : vector<16x128xf32> to vector<16x16xf32>
    %106 = arith.truncf %105 : vector<16x16xf32> to vector<16x16xbf16>
    %c0_44 = arith.constant 0 : index
    %c208 = arith.constant 208 : index
    %107 = vector.load %arg7[%c0_44, %c208] : memref<16x256xbf16, #tpu.memory_space<vmem>>, vector<16x16xbf16>
    tpu.vector_store %arg7[%c0_44, %c208], %106 {strides = array<i32>} : memref<16x256xbf16, #tpu.memory_space<vmem>>, vector<16x16xbf16>,
    %108 = arith.truncf %104 : vector<16x128xf32> to vector<16x128xbf16>
    %cst_45 = arith.constant dense<0.000000e+00> : vector<16x128xf32>
    %109 = tpu.matmul %0, %108, %cst_45 {dimension_numbers = #tpu.dot_dimension_numbers<[1], [0], [0], [1], [0, 0, 1, 1], [], []>} : vector<16x16xbf16>, vector<16x128xbf16>, vector<16x128xf32> -> vector<16x128xf32>
    %cst_46 = arith.constant 2.000000e+00 : f32
    %110 = vector.broadcast %cst_46 : f32 to vector<16x128xf32>
    %111 = arith.mulf %110, %109 : vector<16x128xf32>
    %112 = arith.subf %111, %96 : vector<16x128xf32>
    %113 = vector.extract_strided_slice %112 {offsets = [0, 0], sizes = [16, 16], strides = [1, 1]} : vector<16x128xf32> to vector<16x16xf32>
    %114 = arith.truncf %113 : vector<16x16xf32> to vector<16x16xbf16>
    %c0_47 = arith.constant 0 : index
    %c224 = arith.constant 224 : index
    %115 = vector.load %arg7[%c0_47, %c224] : memref<16x256xbf16, #tpu.memory_space<vmem>>, vector<16x16xbf16>
    tpu.vector_store %arg7[%c0_47, %c224], %114 {strides = array<i32>} : memref<16x256xbf16, #tpu.memory_space<vmem>>, vector<16x16xbf16>,
    %c0_48 = arith.constant 0 : index
    %c0_49 = arith.constant 0 : index
    %116 = vector.load %arg7[%c0_48, %c0_49] : memref<16x256xbf16, #tpu.memory_space<vmem>>, vector<16x256xbf16>
    %c0_50 = arith.constant 0 : index
    %c0_51 = arith.constant 0 : index
    %117 = vector.load %arg2[%c0_50, %c0_51] : memref<256x128xbf16, #tpu.memory_space<vmem>>, vector<256x128xbf16>
    %cst_52 = arith.constant dense<0.000000e+00> : vector<16x128xf32>
    %118 = tpu.matmul %116, %117, %cst_52 {dimension_numbers = #tpu.dot_dimension_numbers<[1], [0], [0], [1], [0, 0, 1, 1], [], []>} : vector<16x256xbf16>, vector<256x128xbf16>, vector<16x128xf32> -> vector<16x128xf32>
    %c0_53 = arith.constant 0 : index
    %c0_54 = arith.constant 0 : index
    %119 = vector.load %arg3[%c0_53, %c0_54] : memref<1x128xf32, #tpu.memory_space<vmem>>, vector<1x128xf32>
    %120 = vector.broadcast %119 : vector<1x128xf32> to vector<16x128xf32>
    %121 = arith.addf %118, %120 : vector<16x128xf32>
    %cst_55 = arith.constant 0.000000e+00 : f32
    %122 = vector.broadcast %cst_55 : f32 to vector<16x128xf32>
    %123 = arith.maximumf %121, %122 : vector<16x128xf32>
    %124 = vector.extract_strided_slice %123 {offsets = [0, 0], sizes = [16, 16], strides = [1, 1]} : vector<16x128xf32> to vector<16x16xf32>
    %125 = arith.truncf %124 : vector<16x16xf32> to vector<16x16xbf16>
    %c0_56 = arith.constant 0 : index
    %c0_57 = arith.constant 0 : index
    %126 = vector.load %arg7[%c0_56, %c0_57] : memref<16x256xbf16, #tpu.memory_space<vmem>>, vector<16x16xbf16>
    tpu.vector_store %arg7[%c0_56, %c0_57], %125 {strides = array<i32>} : memref<16x256xbf16, #tpu.memory_space<vmem>>, vector<16x16xbf16>,
    %127 = arith.truncf %123 : vector<16x128xf32> to vector<16x128xbf16>
    %cst_58 = arith.constant dense<0.000000e+00> : vector<16x128xf32>
    %128 = tpu.matmul %0, %127, %cst_58 {dimension_numbers = #tpu.dot_dimension_numbers<[1], [0], [0], [1], [0, 0, 1, 1], [], []>} : vector<16x16xbf16>, vector<16x128xbf16>, vector<16x128xf32> -> vector<16x128xf32>
    %129 = vector.extract_strided_slice %128 {offsets = [0, 0], sizes = [16, 16], strides = [1, 1]} : vector<16x128xf32> to vector<16x16xf32>
    %130 = arith.truncf %129 : vector<16x16xf32> to vector<16x16xbf16>
    %c0_59 = arith.constant 0 : index
    %c16_60 = arith.constant 16 : index
    %131 = vector.load %arg7[%c0_59, %c16_60] : memref<16x256xbf16, #tpu.memory_space<vmem>>, vector<16x16xbf16>
    tpu.vector_store %arg7[%c0_59, %c16_60], %130 {strides = array<i32>} : memref<16x256xbf16, #tpu.memory_space<vmem>>, vector<16x16xbf16>,
    %132 = arith.truncf %128 : vector<16x128xf32> to vector<16x128xbf16>
    %cst_61 = arith.constant dense<0.000000e+00> : vector<16x128xf32>
    %133 = tpu.matmul %0, %132, %cst_61 {dimension_numbers = #tpu.dot_dimension_numbers<[1], [0], [0], [1], [0, 0, 1, 1], [], []>} : vector<16x16xbf16>, vector<16x128xbf16>, vector<16x128xf32> -> vector<16x128xf32>
    %cst_62 = arith.constant 2.000000e+00 : f32
    %134 = vector.broadcast %cst_62 : f32 to vector<16x128xf32>
    %135 = arith.mulf %134, %133 : vector<16x128xf32>
    %136 = arith.subf %135, %123 : vector<16x128xf32>
    %137 = vector.extract_strided_slice %136 {offsets = [0, 0], sizes = [16, 16], strides = [1, 1]} : vector<16x128xf32> to vector<16x16xf32>
    %138 = arith.truncf %137 : vector<16x16xf32> to vector<16x16xbf16>
    %c0_63 = arith.constant 0 : index
    %c32_64 = arith.constant 32 : index
    %139 = vector.load %arg7[%c0_63, %c32_64] : memref<16x256xbf16, #tpu.memory_space<vmem>>, vector<16x16xbf16>
    tpu.vector_store %arg7[%c0_63, %c32_64], %138 {strides = array<i32>} : memref<16x256xbf16, #tpu.memory_space<vmem>>, vector<16x16xbf16>,
    %140 = arith.truncf %136 : vector<16x128xf32> to vector<16x128xbf16>
    %cst_65 = arith.constant dense<0.000000e+00> : vector<16x128xf32>
    %141 = tpu.matmul %0, %140, %cst_65 {dimension_numbers = #tpu.dot_dimension_numbers<[1], [0], [0], [1], [0, 0, 1, 1], [], []>} : vector<16x16xbf16>, vector<16x128xbf16>, vector<16x128xf32> -> vector<16x128xf32>
    %cst_66 = arith.constant 2.000000e+00 : f32
    %142 = vector.broadcast %cst_66 : f32 to vector<16x128xf32>
    %143 = arith.mulf %142, %141 : vector<16x128xf32>
    %144 = arith.subf %143, %128 : vector<16x128xf32>
    %145 = vector.extract_strided_slice %144 {offsets = [0, 0], sizes = [16, 16], strides = [1, 1]} : vector<16x128xf32> to vector<16x16xf32>
    %146 = arith.truncf %145 : vector<16x16xf32> to vector<16x16xbf16>
    %c0_67 = arith.constant 0 : index
    %c48_68 = arith.constant 48 : index
    %147 = vector.load %arg7[%c0_67, %c48_68] : memref<16x256xbf16, #tpu.memory_space<vmem>>, vector<16x16xbf16>
    tpu.vector_store %arg7[%c0_67, %c48_68], %146 {strides = array<i32>} : memref<16x256xbf16, #tpu.memory_space<vmem>>, vector<16x16xbf16>,
    %148 = arith.truncf %144 : vector<16x128xf32> to vector<16x128xbf16>
    %cst_69 = arith.constant dense<0.000000e+00> : vector<16x128xf32>
    %149 = tpu.matmul %0, %148, %cst_69 {dimension_numbers = #tpu.dot_dimension_numbers<[1], [0], [0], [1], [0, 0, 1, 1], [], []>} : vector<16x16xbf16>, vector<16x128xbf16>, vector<16x128xf32> -> vector<16x128xf32>
    %cst_70 = arith.constant 2.000000e+00 : f32
    %150 = vector.broadcast %cst_70 : f32 to vector<16x128xf32>
    %151 = arith.mulf %150, %149 : vector<16x128xf32>
    %152 = arith.subf %151, %136 : vector<16x128xf32>
    %153 = vector.extract_strided_slice %152 {offsets = [0, 0], sizes = [16, 16], strides = [1, 1]} : vector<16x128xf32> to vector<16x16xf32>
    %154 = arith.truncf %153 : vector<16x16xf32> to vector<16x16xbf16>
    %c0_71 = arith.constant 0 : index
    %c64_72 = arith.constant 64 : index
    %155 = vector.load %arg7[%c0_71, %c64_72] : memref<16x256xbf16, #tpu.memory_space<vmem>>, vector<16x16xbf16>
    tpu.vector_store %arg7[%c0_71, %c64_72], %154 {strides = array<i32>} : memref<16x256xbf16, #tpu.memory_space<vmem>>, vector<16x16xbf16>,
    %156 = arith.truncf %152 : vector<16x128xf32> to vector<16x128xbf16>
    %cst_73 = arith.constant dense<0.000000e+00> : vector<16x128xf32>
    %157 = tpu.matmul %0, %156, %cst_73 {dimension_numbers = #tpu.dot_dimension_numbers<[1], [0], [0], [1], [0, 0, 1, 1], [], []>} : vector<16x16xbf16>, vector<16x128xbf16>, vector<16x128xf32> -> vector<16x128xf32>
    %cst_74 = arith.constant 2.000000e+00 : f32
    %158 = vector.broadcast %cst_74 : f32 to vector<16x128xf32>
    %159 = arith.mulf %158, %157 : vector<16x128xf32>
    %160 = arith.subf %159, %144 : vector<16x128xf32>
    %161 = vector.extract_strided_slice %160 {offsets = [0, 0], sizes = [16, 16], strides = [1, 1]} : vector<16x128xf32> to vector<16x16xf32>
    %162 = arith.truncf %161 : vector<16x16xf32> to vector<16x16xbf16>
    %c0_75 = arith.constant 0 : index
    %c80_76 = arith.constant 80 : index
    %163 = vector.load %arg7[%c0_75, %c80_76] : memref<16x256xbf16, #tpu.memory_space<vmem>>, vector<16x16xbf16>
    tpu.vector_store %arg7[%c0_75, %c80_76], %162 {strides = array<i32>} : memref<16x256xbf16, #tpu.memory_space<vmem>>, vector<16x16xbf16>,
    %164 = arith.truncf %160 : vector<16x128xf32> to vector<16x128xbf16>
    %cst_77 = arith.constant dense<0.000000e+00> : vector<16x128xf32>
    %165 = tpu.matmul %0, %164, %cst_77 {dimension_numbers = #tpu.dot_dimension_numbers<[1], [0], [0], [1], [0, 0, 1, 1], [], []>} : vector<16x16xbf16>, vector<16x128xbf16>, vector<16x128xf32> -> vector<16x128xf32>
    %cst_78 = arith.constant 2.000000e+00 : f32
    %166 = vector.broadcast %cst_78 : f32 to vector<16x128xf32>
    %167 = arith.mulf %166, %165 : vector<16x128xf32>
    %168 = arith.subf %167, %152 : vector<16x128xf32>
    %169 = vector.extract_strided_slice %168 {offsets = [0, 0], sizes = [16, 16], strides = [1, 1]} : vector<16x128xf32> to vector<16x16xf32>
    %170 = arith.truncf %169 : vector<16x16xf32> to vector<16x16xbf16>
    %c0_79 = arith.constant 0 : index
    %c96_80 = arith.constant 96 : index
    %171 = vector.load %arg7[%c0_79, %c96_80] : memref<16x256xbf16, #tpu.memory_space<vmem>>, vector<16x16xbf16>
    tpu.vector_store %arg7[%c0_79, %c96_80], %170 {strides = array<i32>} : memref<16x256xbf16, #tpu.memory_space<vmem>>, vector<16x16xbf16>,
    %172 = arith.truncf %168 : vector<16x128xf32> to vector<16x128xbf16>
    %cst_81 = arith.constant dense<0.000000e+00> : vector<16x128xf32>
    %173 = tpu.matmul %0, %172, %cst_81 {dimension_numbers = #tpu.dot_dimension_numbers<[1], [0], [0], [1], [0, 0, 1, 1], [], []>} : vector<16x16xbf16>, vector<16x128xbf16>, vector<16x128xf32> -> vector<16x128xf32>
    %cst_82 = arith.constant 2.000000e+00 : f32
    %174 = vector.broadcast %cst_82 : f32 to vector<16x128xf32>
    %175 = arith.mulf %174, %173 : vector<16x128xf32>
    %176 = arith.subf %175, %160 : vector<16x128xf32>
    %177 = vector.extract_strided_slice %176 {offsets = [0, 0], sizes = [16, 16], strides = [1, 1]} : vector<16x128xf32> to vector<16x16xf32>
    %178 = arith.truncf %177 : vector<16x16xf32> to vector<16x16xbf16>
    %c0_83 = arith.constant 0 : index
    %c112_84 = arith.constant 112 : index
    %179 = vector.load %arg7[%c0_83, %c112_84] : memref<16x256xbf16, #tpu.memory_space<vmem>>, vector<16x16xbf16>
    tpu.vector_store %arg7[%c0_83, %c112_84], %178 {strides = array<i32>} : memref<16x256xbf16, #tpu.memory_space<vmem>>, vector<16x16xbf16>,
    %180 = arith.truncf %176 : vector<16x128xf32> to vector<16x128xbf16>
    %cst_85 = arith.constant dense<0.000000e+00> : vector<16x128xf32>
    %181 = tpu.matmul %0, %180, %cst_85 {dimension_numbers = #tpu.dot_dimension_numbers<[1], [0], [0], [1], [0, 0, 1, 1], [], []>} : vector<16x16xbf16>, vector<16x128xbf16>, vector<16x128xf32> -> vector<16x128xf32>
    %cst_86 = arith.constant 2.000000e+00 : f32
    %182 = vector.broadcast %cst_86 : f32 to vector<16x128xf32>
    %183 = arith.mulf %182, %181 : vector<16x128xf32>
    %184 = arith.subf %183, %168 : vector<16x128xf32>
    %185 = vector.extract_strided_slice %184 {offsets = [0, 0], sizes = [16, 16], strides = [1, 1]} : vector<16x128xf32> to vector<16x16xf32>
    %186 = arith.truncf %185 : vector<16x16xf32> to vector<16x16xbf16>
    %c0_87 = arith.constant 0 : index
    %c128_88 = arith.constant 128 : index
    %187 = vector.load %arg7[%c0_87, %c128_88] : memref<16x256xbf16, #tpu.memory_space<vmem>>, vector<16x16xbf16>
    tpu.vector_store %arg7[%c0_87, %c128_88], %186 {strides = array<i32>} : memref<16x256xbf16, #tpu.memory_space<vmem>>, vector<16x16xbf16>,
    %188 = arith.truncf %184 : vector<16x128xf32> to vector<16x128xbf16>
    %cst_89 = arith.constant dense<0.000000e+00> : vector<16x128xf32>
    %189 = tpu.matmul %0, %188, %cst_89 {dimension_numbers = #tpu.dot_dimension_numbers<[1], [0], [0], [1], [0, 0, 1, 1], [], []>} : vector<16x16xbf16>, vector<16x128xbf16>, vector<16x128xf32> -> vector<16x128xf32>
    %cst_90 = arith.constant 2.000000e+00 : f32
    %190 = vector.broadcast %cst_90 : f32 to vector<16x128xf32>
    %191 = arith.mulf %190, %189 : vector<16x128xf32>
    %192 = arith.subf %191, %176 : vector<16x128xf32>
    %193 = vector.extract_strided_slice %192 {offsets = [0, 0], sizes = [16, 16], strides = [1, 1]} : vector<16x128xf32> to vector<16x16xf32>
    %194 = arith.truncf %193 : vector<16x16xf32> to vector<16x16xbf16>
    %c0_91 = arith.constant 0 : index
    %c144_92 = arith.constant 144 : index
    %195 = vector.load %arg7[%c0_91, %c144_92] : memref<16x256xbf16, #tpu.memory_space<vmem>>, vector<16x16xbf16>
    tpu.vector_store %arg7[%c0_91, %c144_92], %194 {strides = array<i32>} : memref<16x256xbf16, #tpu.memory_space<vmem>>, vector<16x16xbf16>,
    %196 = arith.truncf %192 : vector<16x128xf32> to vector<16x128xbf16>
    %cst_93 = arith.constant dense<0.000000e+00> : vector<16x128xf32>
    %197 = tpu.matmul %0, %196, %cst_93 {dimension_numbers = #tpu.dot_dimension_numbers<[1], [0], [0], [1], [0, 0, 1, 1], [], []>} : vector<16x16xbf16>, vector<16x128xbf16>, vector<16x128xf32> -> vector<16x128xf32>
    %cst_94 = arith.constant 2.000000e+00 : f32
    %198 = vector.broadcast %cst_94 : f32 to vector<16x128xf32>
    %199 = arith.mulf %198, %197 : vector<16x128xf32>
    %200 = arith.subf %199, %184 : vector<16x128xf32>
    %201 = vector.extract_strided_slice %200 {offsets = [0, 0], sizes = [16, 16], strides = [1, 1]} : vector<16x128xf32> to vector<16x16xf32>
    %202 = arith.truncf %201 : vector<16x16xf32> to vector<16x16xbf16>
    %c0_95 = arith.constant 0 : index
    %c160_96 = arith.constant 160 : index
    %203 = vector.load %arg7[%c0_95, %c160_96] : memref<16x256xbf16, #tpu.memory_space<vmem>>, vector<16x16xbf16>
    tpu.vector_store %arg7[%c0_95, %c160_96], %202 {strides = array<i32>} : memref<16x256xbf16, #tpu.memory_space<vmem>>, vector<16x16xbf16>,
    %204 = arith.truncf %200 : vector<16x128xf32> to vector<16x128xbf16>
    %cst_97 = arith.constant dense<0.000000e+00> : vector<16x128xf32>
    %205 = tpu.matmul %0, %204, %cst_97 {dimension_numbers = #tpu.dot_dimension_numbers<[1], [0], [0], [1], [0, 0, 1, 1], [], []>} : vector<16x16xbf16>, vector<16x128xbf16>, vector<16x128xf32> -> vector<16x128xf32>
    %cst_98 = arith.constant 2.000000e+00 : f32
    %206 = vector.broadcast %cst_98 : f32 to vector<16x128xf32>
    %207 = arith.mulf %206, %205 : vector<16x128xf32>
    %208 = arith.subf %207, %192 : vector<16x128xf32>
    %209 = vector.extract_strided_slice %208 {offsets = [0, 0], sizes = [16, 16], strides = [1, 1]} : vector<16x128xf32> to vector<16x16xf32>
    %210 = arith.truncf %209 : vector<16x16xf32> to vector<16x16xbf16>
    %c0_99 = arith.constant 0 : index
    %c176_100 = arith.constant 176 : index
    %211 = vector.load %arg7[%c0_99, %c176_100] : memref<16x256xbf16, #tpu.memory_space<vmem>>, vector<16x16xbf16>
    tpu.vector_store %arg7[%c0_99, %c176_100], %210 {strides = array<i32>} : memref<16x256xbf16, #tpu.memory_space<vmem>>, vector<16x16xbf16>,
    %212 = arith.truncf %208 : vector<16x128xf32> to vector<16x128xbf16>
    %cst_101 = arith.constant dense<0.000000e+00> : vector<16x128xf32>
    %213 = tpu.matmul %0, %212, %cst_101 {dimension_numbers = #tpu.dot_dimension_numbers<[1], [0], [0], [1], [0, 0, 1, 1], [], []>} : vector<16x16xbf16>, vector<16x128xbf16>, vector<16x128xf32> -> vector<16x128xf32>
    %cst_102 = arith.constant 2.000000e+00 : f32
    %214 = vector.broadcast %cst_102 : f32 to vector<16x128xf32>
    %215 = arith.mulf %214, %213 : vector<16x128xf32>
    %216 = arith.subf %215, %200 : vector<16x128xf32>
    %217 = vector.extract_strided_slice %216 {offsets = [0, 0], sizes = [16, 16], strides = [1, 1]} : vector<16x128xf32> to vector<16x16xf32>
    %218 = arith.truncf %217 : vector<16x16xf32> to vector<16x16xbf16>
    %c0_103 = arith.constant 0 : index
    %c192_104 = arith.constant 192 : index
    %219 = vector.load %arg7[%c0_103, %c192_104] : memref<16x256xbf16, #tpu.memory_space<vmem>>, vector<16x16xbf16>
    tpu.vector_store %arg7[%c0_103, %c192_104], %218 {strides = array<i32>} : memref<16x256xbf16, #tpu.memory_space<vmem>>, vector<16x16xbf16>,
    %220 = arith.truncf %216 : vector<16x128xf32> to vector<16x128xbf16>
    %cst_105 = arith.constant dense<0.000000e+00> : vector<16x128xf32>
    %221 = tpu.matmul %0, %220, %cst_105 {dimension_numbers = #tpu.dot_dimension_numbers<[1], [0], [0], [1], [0, 0, 1, 1], [], []>} : vector<16x16xbf16>, vector<16x128xbf16>, vector<16x128xf32> -> vector<16x128xf32>
    %cst_106 = arith.constant 2.000000e+00 : f32
    %222 = vector.broadcast %cst_106 : f32 to vector<16x128xf32>
    %223 = arith.mulf %222, %221 : vector<16x128xf32>
    %224 = arith.subf %223, %208 : vector<16x128xf32>
    %225 = vector.extract_strided_slice %224 {offsets = [0, 0], sizes = [16, 16], strides = [1, 1]} : vector<16x128xf32> to vector<16x16xf32>
    %226 = arith.truncf %225 : vector<16x16xf32> to vector<16x16xbf16>
    %c0_107 = arith.constant 0 : index
    %c208_108 = arith.constant 208 : index
    %227 = vector.load %arg7[%c0_107, %c208_108] : memref<16x256xbf16, #tpu.memory_space<vmem>>, vector<16x16xbf16>
    tpu.vector_store %arg7[%c0_107, %c208_108], %226 {strides = array<i32>} : memref<16x256xbf16, #tpu.memory_space<vmem>>, vector<16x16xbf16>,
    %228 = arith.truncf %224 : vector<16x128xf32> to vector<16x128xbf16>
    %cst_109 = arith.constant dense<0.000000e+00> : vector<16x128xf32>
    %229 = tpu.matmul %0, %228, %cst_109 {dimension_numbers = #tpu.dot_dimension_numbers<[1], [0], [0], [1], [0, 0, 1, 1], [], []>} : vector<16x16xbf16>, vector<16x128xbf16>, vector<16x128xf32> -> vector<16x128xf32>
    %cst_110 = arith.constant 2.000000e+00 : f32
    %230 = vector.broadcast %cst_110 : f32 to vector<16x128xf32>
    %231 = arith.mulf %230, %229 : vector<16x128xf32>
    %232 = arith.subf %231, %216 : vector<16x128xf32>
    %233 = vector.extract_strided_slice %232 {offsets = [0, 0], sizes = [16, 16], strides = [1, 1]} : vector<16x128xf32> to vector<16x16xf32>
    %234 = arith.truncf %233 : vector<16x16xf32> to vector<16x16xbf16>
    %c0_111 = arith.constant 0 : index
    %c224_112 = arith.constant 224 : index
    %235 = vector.load %arg7[%c0_111, %c224_112] : memref<16x256xbf16, #tpu.memory_space<vmem>>, vector<16x16xbf16>
    tpu.vector_store %arg7[%c0_111, %c224_112], %234 {strides = array<i32>} : memref<16x256xbf16, #tpu.memory_space<vmem>>, vector<16x16xbf16>,
    %c0_113 = arith.constant 0 : index
    %c0_114 = arith.constant 0 : index
    %236 = vector.load %arg7[%c0_113, %c0_114] : memref<16x256xbf16, #tpu.memory_space<vmem>>, vector<16x256xbf16>
    %c0_115 = arith.constant 0 : index
    %c0_116 = arith.constant 0 : index
    %237 = vector.load %arg4[%c0_115, %c0_116] : memref<256x128xbf16, #tpu.memory_space<vmem>>, vector<256x128xbf16>
    %cst_117 = arith.constant dense<0.000000e+00> : vector<16x128xf32>
    %238 = tpu.matmul %236, %237, %cst_117 {dimension_numbers = #tpu.dot_dimension_numbers<[1], [0], [0], [1], [0, 0, 1, 1], [], []>} : vector<16x256xbf16>, vector<256x128xbf16>, vector<16x128xf32> -> vector<16x128xf32>
    %c0_118 = arith.constant 0 : index
    %c0_119 = arith.constant 0 : index
    %239 = vector.load %arg5[%c0_118, %c0_119] : memref<1x128xf32, #tpu.memory_space<vmem>>, vector<1x128xf32>
    %240 = vector.broadcast %239 : vector<1x128xf32> to vector<16x128xf32>
    %241 = arith.addf %238, %240 : vector<16x128xf32>
    %242 = tpu.iota {dimensions = array<i32: 1>} : vector<16x128xi32>
    %c4_i32 = arith.constant 4 : i32
    %243 = vector.broadcast %c4_i32 : i32 to vector<16x128xi32>
    %244 = arith.cmpi slt, %242, %243 : vector<16x128xi32>
    %cst_120 = arith.constant 0xFF800000 : f32
    %245 = vector.broadcast %cst_120 : f32 to vector<16x128xf32>
    %246 = arith.select %244, %241, %245 : vector<16x128xi1>, vector<16x128xf32>
    %cst_121 = arith.constant dense<0xFF800000> : vector<16xf32>
    %247 = vector.multi_reduction <maximumf>, %246, %cst_121 [1] : vector<16x128xf32> to vector<16xf32>
    %248 = vector.shape_cast %247 : vector<16xf32> to vector<16x1xf32>
    %249 = vector.broadcast %248 : vector<16x1xf32> to vector<16x128xf32>
    %250 = arith.subf %241, %249 : vector<16x128xf32>
    %251 = math.exp %250 : vector<16x128xf32>
    %cst_122 = arith.constant 0.000000e+00 : f32
    %252 = vector.broadcast %cst_122 : f32 to vector<16x128xf32>
    %253 = arith.select %244, %251, %252 : vector<16x128xi1>, vector<16x128xf32>
    %cst_123 = arith.constant dense<0.000000e+00> : vector<16xf32>
    %254 = vector.multi_reduction <add>, %253, %cst_123 [1] : vector<16x128xf32> to vector<16xf32>
    %255 = vector.shape_cast %254 : vector<16xf32> to vector<16x1xf32>
    %256 = math.log %255 : vector<16x1xf32>
    %257 = vector.broadcast %256 : vector<16x1xf32> to vector<16x128xf32>
    %258 = arith.subf %250, %257 : vector<16x128xf32>
    %c0_124 = arith.constant 0 : index
    %c0_125 = arith.constant 0 : index
    %259 = vector.load %arg6[%c0_124, %c0_125] : memref<16x128xf32, #tpu.memory_space<vmem>>, vector<16x128xf32>
    tpu.vector_store %arg6[%c0_124, %c0_125], %258 {strides = array<i32>} : memref<16x128xf32, #tpu.memory_space<vmem>>, vector<16x128xf32>,
    return
  }
}

</mosaic_0001>

<bundles_post_ra>
// kernel: tpu_custom_call.1
= control target key start
LH: loop header
LB: loop body
LE: loop exit
PB: predicated region body
PF: predicated region fallthrough
CT: control target
= control target key end

     0   :  { %11 = vsyncpa [#allocation4], 0  ;;  %s3181_s0 = inlined_call_operand.hbm [shape: bf16[16,16], index: 0, kind: input, shape index: {}]   ;;  %s3182_s1 = inlined_call_operand.hbm [shape: f32[16,128], index: 1, kind: input, shape index: {}]   ;;  %s3183_s2 = inlined_call_operand.hbm [shape: bf16[256,128], index: 2, kind: input, shape index: {}]   ;;  %s3184_s3 = inlined_call_operand.vmem [shape: f32[1,128], index: 3, kind: input, shape index: {}]   ;;  %s3185_s4 = inlined_call_operand.hbm [shape: bf16[256,128], index: 4, kind: input, shape index: {}]   ;;  %s3186_s5 = inlined_call_operand.vmem [shape: f32[1,128], index: 5, kind: input, shape index: {}]   ;;  %s3187_s6 = inlined_call_operand.hbm [shape: f32[16,128], index: 6, kind: output, shape index: {}]  }
   0x1   :  { %12 = vsyncpa [#allocation7], 0 }
   0x2   :  { %13 = vsyncpa [#allocation10], 0 }
   0x3   :  { %14 = vsyncpa [#allocation5], 0  ;;  %s2811_s21 = smov [#allocation6]  }
   0x4   :  { %s32_s22 = sshll.u32 %s2811_s21, 4  ;;  %s33_s22 = int_to_ptr.vmem [resolvable:$true] %s32_s22 }
   0x5   :  { %s2711_s23 = scalar_lea.vmem %s33_s22, 256  ;;  %p2716_p1 = scmp.lt.s32.totalorder %s33_s22, %s33_s22 }
   0x6   :  { %p2712_p0 = scmp.ne.s32.totalorder %s33_s22, %s2711_s23  ;;  %p2717_p2 = scmp.lt.s32.totalorder %s2711_s23, %s2711_s23 }
   0x8   :  { %p2718_p3 = por %p2717_p2, %p2716_p1 }
   0xa   :  { %p2719_p4 = pnand %p2718_p3, %p2712_p0 }
   0xc   :  { %2722 = shalt.err (!%p2719_p4)
}
   0xd   :  { %s2812_s24 = smov 128   ;;  %s2813_s25 = smov 8  }
   0xe   :  { %38 = dma.hbm_to_vmem [thread:$0]  %s3182_s1, 256, %s33_s22, [#allocation7], %s2812_s24, %s2812_s24, %s2813_s25  }
   0xf   :  { %s2814_s28 = smov [#allocation3]  }
  0x10   :  { %s20_s29 = sshll.u32 %s2814_s28, 4  ;;  %s21_s29 = int_to_ptr.vmem [resolvable:$true] %s20_s29 }
  0x11   :  { %s2731_s30 = scalar_lea.vmem %s21_s29, 128  ;;  %p2736_p6 = scmp.lt.s32.totalorder %s21_s29, %s21_s29 }
  0x12   :  { %p2732_p5 = scmp.ne.s32.totalorder %s21_s29, %s2731_s30  ;;  %p2737_p7 = scmp.lt.s32.totalorder %s2731_s30, %s2731_s30 }
  0x14   :  { %p2738_p8 = por %p2737_p7, %p2736_p6 }
  0x16   :  { %p2739_p9 = pnand %p2738_p8, %p2732_p5 }
  0x18   :  { %2742 = shalt.err (!%p2739_p9)
}
  0x19   :  { %s2815_s7 = smov 64   ;;  %s2816_s8 = smov 4  }
  0x1a   :  { %26 = dma.hbm_to_vmem [thread:$0]  %s3181_s0, 128, %s21_s29, [#allocation4], %s2815_s7, %s2815_s7, %s2816_s8  }
  0x1b   :  { %s2817_s11 = smov [#allocation8]   ;;  %s2818_s12 = smov [#allocation9]  }
  0x1c   :  { %s44_s1 = sshll.u32 %s2817_s11, 4  ;;  %s58_s13 = sshll.u32 %s2818_s12, 4  ;;  %s45_s1 = int_to_ptr.vmem [resolvable:$true] %s44_s1  ;;  %s59_s13 = int_to_ptr.vmem [resolvable:$true] %s58_s13 }
  0x1d   :  { %s2751_s14 = scalar_lea.vmem %s45_s1, 2048  ;;  %p2756_p11 = scmp.lt.s32.totalorder %s45_s1, %s45_s1 }
  0x1e   :  { %p2752_p10 = scmp.ne.s32.totalorder %s45_s1, %s2751_s14  ;;  %p2757_p12 = scmp.lt.s32.totalorder %s2751_s14, %s2751_s14 }
  0x20   :  { %p2758_p13 = por %p2757_p12, %p2756_p11 }
  0x22   :  { %p2759_p0 = pnand %p2758_p13, %p2752_p10 }
  0x24   :  { %2762 = shalt.err (!%p2759_p0)
}
  0x25   :  { %50 = dma.hbm_to_vmem [thread:$0]  %s3183_s2, 2048, %s45_s1, [#allocation7], %s2815_s7, %s2815_s7, %s2816_s8  }
  0x26   :  { %s2771_s0 = scalar_lea.vmem %s59_s13, 2048  ;;  %p2776_p2 = scmp.lt.s32.totalorder %s59_s13, %s59_s13 }
  0x27   :  { %p2772_p1 = scmp.ne.s32.totalorder %s59_s13, %s2771_s0  ;;  %p2777_p3 = scmp.lt.s32.totalorder %s2771_s0, %s2771_s0 }
  0x29   :  { %p2778_p4 = por %p2777_p3, %p2776_p2 }
  0x2b   :  { %p2779_p5 = pnand %p2778_p4, %p2772_p1 }
  0x2d   :  { %2782 = shalt.err (!%p2779_p5)
}
  0x2e   :  { %64 = dma.hbm_to_vmem [thread:$0]  %s3185_s4, 2048, %s59_s13, [#allocation10], %s2815_s7, %s2815_s7, %s2816_s8  }
  0x2f   :  { %2803 = dma.done.wait [#allocation4], 128  }
  0x30   :  { %2804 = vsyncadd [#allocation4], 4294967168 }
  0x31   :  { %2805 = dma.done.wait [#allocation7], 2304  }
  0x32   :  { %2806 = vsyncadd [#allocation7], 4294964992 }
  0x33   :  { %2807 = dma.done.wait [#allocation10], 2048  }
  0x34   :  { %2808 = vsyncadd [#allocation10], 4294965248  ;;  %v2819_v0 = vmov 0.0   ;;  %vm2820_vm0 = vmmov 0   ;;  %v84_v1 = vld [vmem:[#allocation6] sm:$0xff]  ;;  %v85_v2 = vld [vmem:[#allocation6 + $0x8] sm:$0xff] }
  0x35   :  { %2472 = vmatprep.subr.bf16.mxu1 %v2819_v0  ;;  %2474 = vmatprep.mubr.msk.bf16.mxu1 %vm2820_vm0, %v2819_v0  ;;  %v86_v3 = vpack.c.bf16 %v85_v2, %v84_v1  ;;  %v2891_v4 = vld [vmem:[#allocation3] sm:$0xff]   ;;  %vm102_vm1 = vcmask 130048   ;;  %v2312_v5 = vpack.c.bf16 %v84_v1, %v84_v1  ;;  %v2313_v6 = vpack.c.bf16 %v85_v2, %v85_v2  ;;  %s2822_s2 = smov 16   ;;  %s2823_s4 = smov 32  }
  0x36   :  { %2496 = vmatprep.subr.bf16.mxu0 %v2819_v0  ;;  %2498 = vmatprep.mubr.msk.bf16.mxu0 %vm2820_vm0, %v2819_v0  ;;  %vm94_vm2 = vcmask 125952   ;;  %v2821_v7 = vmov 0   ;;  %vm159_vm3 = vcmask 257152   ;;  %vm219_vm4 = vcmask 388352   ;;  %s2824_s19 = smov 48   ;;  %s2825_s20 = smov 80  }
  0x37   :  { %2473 = vmatpush3.bf16.msra.mxu1 %v86_v3  ;;  %82 = vst [vmem:[#allocation2] sm:$0xff] %v2821_v7  ;;  %83 = vst [vmem:[#allocation2 + $0x8] sm:$0xff] %v2821_v7  ;;  %vm279_vm5 = vcmask 519552   ;;  %vm339_vm6 = vcmask 650752   ;;  %vm399_vm7 = vcmask 781952   ;;  %s2826_s21 = smov 96  }
  0x38   :  { %2478 = vmatprep.subr.bf16.mxu1 %v2819_v0  ;;  %95 = vst.msk [vmem:[#allocation2] sm:$0xf] %vm94_vm2, %v2312_v5  ;;  %96 = vst.msk [vmem:[#allocation2 + $0x8] sm:$0xf] %vm94_vm2, %v2313_v6  ;;  %vm459_vm8 = vcmask 913152   ;;  %s2827_s22 = smov 112  }
  0x39   :  { %vm519_vm9 = vcmask 1044352  }
  0x3a   :  { %2475 = vmatmul.mubr.msk.bf16.vlgmr.msra.gmra.mxu1 %vm102_vm1, %v2891_v4 }
  0x3b   :  { %2480 = vmatprep.mubr.msk.bf16.mxu1 %vm2820_vm0, %v2819_v0 }
  0xfa   :  { %v140_v8 = vpop.f32.mrf.mxu1 }
  0xfb   :  { %v2314_v9 = vpack.c.bf16 %v140_v8, %v140_v8 }
  0xfc   :  { %v2476_v10 = vpop.f32.mrf.mxu1 }
  0xfd   :  { %153 = vrot.lane.b32.xlu0 %v2314_v9, %s2822_s2 }
  0xfe   :  { %v143_v11 = vpop.f32.mrf.mxu1 }
  0xff   :  { %v147_v12 = vpack.c.bf16 %v143_v11, %v140_v8  ;;  %v2315_v13 = vpack.c.bf16 %v143_v11, %v143_v11 }
 0x100   :  { %v2477_v14 = vpop.f32.mrf.mxu1 }
 0x101   :  { %155 = vrot.lane.b32.xlu0 %v2315_v13, %s2822_s2  ;;  %2479 = vmatpush3.bf16.msra.mxu1 %v147_v12 }
 0x102   :  { %2484 = vmatprep.subr.bf16.mxu1 %v2819_v0 }
 0x104   :  { %2481 = vmatmul.mubr.msk.bf16.vlgmr.msra.gmra.mxu1 %vm102_vm1, %v2891_v4 }
 0x105   :  { %2486 = vmatprep.mubr.msk.bf16.mxu1 %vm2820_vm0, %v2819_v0 }
 0x16f   :  { %v154_v15 = vpop.permute.xlu0 %153 }
 0x170   :  { %160 = vst.msk [vmem:[#allocation2] sm:$0xf] %vm159_vm3, %v154_v15 }
 0x173   :  { %v156_v16 = vpop.permute.xlu0 %155 }
 0x174   :  { %161 = vst.msk [vmem:[#allocation2 + $0x8] sm:$0xf] %vm159_vm3, %v156_v16 }
 0x1c4   :  { %v196_v17 = vpop.f32.mrf.mxu1 }
 0x1c5   :  { %v203_v18 = vmul.f32 2.0, %v196_v17 }
 0x1c6   :  { %v2482_v19 = vpop.f32.mrf.mxu1 }
 0x1c7   :  { %v205_v20 = vsub.f32 %v203_v18, %v84_v1 }
 0x1c8   :  { %v199_v21 = vpop.f32.mrf.mxu1 }
 0x1c9   :  { %v204_v22 = vmul.f32 2.0, %v199_v21  ;;  %v2316_v23 = vpack.c.bf16 %v205_v20, %v205_v20 }
 0x1ca   :  { %v2483_v24 = vpop.f32.mrf.mxu1 }
 0x1cb   :  { %v206_v25 = vsub.f32 %v204_v22, %v85_v2  ;;  %213 = vrot.lane.b32.xlu1 %v2316_v23, %s2823_s4 }
 0x1cd   :  { %v207_v26 = vpack.c.bf16 %v206_v25, %v205_v20  ;;  %v2317_v27 = vpack.c.bf16 %v206_v25, %v206_v25 }
 0x1cf   :  { %215 = vrot.lane.b32.xlu1 %v2317_v27, %s2823_s4  ;;  %2485 = vmatpush3.bf16.msra.mxu1 %v207_v26 }
 0x1d0   :  { %2490 = vmatprep.subr.bf16.mxu1 %v2819_v0 }
 0x1d2   :  { %2487 = vmatmul.mubr.msk.bf16.vlgmr.msra.gmra.mxu1 %vm102_vm1, %v2891_v4 }
 0x1d3   :  { %2492 = vmatprep.mubr.msk.bf16.mxu1 %vm2820_vm0, %v2819_v0 }
 0x23d   :  { %v214_v28 = vpop.permute.xlu1 %213 }
 0x23e   :  { %220 = vst.msk [vmem:[#allocation2] sm:$0xf] %vm219_vm4, %v214_v28 }
 0x241   :  { %v216_v29 = vpop.permute.xlu1 %215 }
 0x242   :  { %221 = vst.msk [vmem:[#allocation2 + $0x8] sm:$0xf] %vm219_vm4, %v216_v29 }
 0x292   :  { %v256_v30 = vpop.f32.mrf.mxu1 }
 0x293   :  { %v263_v31 = vmul.f32 2.0, %v256_v30 }
 0x294   :  { %v2488_v32 = vpop.f32.mrf.mxu1 }
 0x295   :  { %v265_v33 = vsub.f32 %v263_v31, %v140_v8 }
 0x296   :  { %v259_v34 = vpop.f32.mrf.mxu1 }
 0x297   :  { %v264_v35 = vmul.f32 2.0, %v259_v34  ;;  %v2318_v36 = vpack.c.bf16 %v265_v33, %v265_v33 }
 0x298   :  { %v2489_v37 = vpop.f32.mrf.mxu1 }
 0x299   :  { %v266_v38 = vsub.f32 %v264_v35, %v143_v11  ;;  %273 = vrot.lane.b32.xlu0 %v2318_v36, %s2824_s19 }
 0x29b   :  { %v267_v39 = vpack.c.bf16 %v266_v38, %v265_v33  ;;  %v2319_v40 = vpack.c.bf16 %v266_v38, %v266_v38 }
 0x29d   :  { %275 = vrot.lane.b32.xlu1 %v2319_v40, %s2824_s19  ;;  %2491 = vmatpush3.bf16.msra.mxu1 %v267_v39 }
 0x29e   :  { %2502 = vmatprep.subr.bf16.mxu1 %v2819_v0 }
 0x2a0   :  { %2493 = vmatmul.mubr.msk.bf16.vlgmr.msra.gmra.mxu1 %vm102_vm1, %v2891_v4 }
 0x2a1   :  { %2504 = vmatprep.mubr.msk.bf16.mxu1 %vm2820_vm0, %v2819_v0 }
 0x30b   :  { %v274_v41 = vpop.permute.xlu0 %273 }
 0x30c   :  { %280 = vst.msk [vmem:[#allocation2] sm:$0xf] %vm279_vm5, %v274_v41 }
 0x30f   :  { %v276_v42 = vpop.permute.xlu1 %275 }
 0x310   :  { %281 = vst.msk [vmem:[#allocation2 + $0x8] sm:$0xf] %vm279_vm5, %v276_v42 }
 0x360   :  { %v316_v43 = vpop.f32.mrf.mxu1 }
 0x361   :  { %v323_v44 = vmul.f32 2.0, %v316_v43 }
 0x362   :  { %v2494_v45 = vpop.f32.mrf.mxu1 }
 0x363   :  { %v325_v46 = vsub.f32 %v323_v44, %v205_v20 }
 0x364   :  { %v319_v47 = vpop.f32.mrf.mxu1 }
 0x365   :  { %v324_v48 = vmul.f32 2.0, %v319_v47  ;;  %v2320_v49 = vpack.c.bf16 %v325_v46, %v325_v46 }
 0x366   :  { %v2495_v50 = vpop.f32.mrf.mxu1 }
 0x367   :  { %v326_v51 = vsub.f32 %v324_v48, %v206_v25  ;;  %333 = vrot.lane.b32.xlu0 %v2320_v49, %s2815_s7 }
 0x369   :  { %v2321_v52 = vpack.c.bf16 %v326_v51, %v326_v51  ;;  %v327_v53 = vpack.c.bf16 %v326_v51, %v325_v46 }
 0x36b   :  { %335 = vrot.lane.b32.xlu1 %v2321_v52, %s2815_s7  ;;  %2497 = vmatpush3.bf16.msra.mxu0 %v327_v53 }
 0x36c   :  { %2508 = vmatprep.subr.bf16.mxu0 %v2819_v0 }
 0x36e   :  { %2499 = vmatmul.mubr.msk.bf16.vlgmr.msra.gmra.mxu0 %vm102_vm1, %v2891_v4 }
 0x36f   :  { %2510 = vmatprep.mubr.msk.bf16.mxu0 %vm2820_vm0, %v2819_v0 }
 0x3d9   :  { %v334_v54 = vpop.permute.xlu0 %333 }
 0x3da   :  { %340 = vst.msk [vmem:[#allocation2] sm:$0xf] %vm339_vm6, %v334_v54 }
 0x3dd   :  { %v336_v55 = vpop.permute.xlu1 %335 }
 0x3de   :  { %341 = vst.msk [vmem:[#allocation2 + $0x8] sm:$0xf] %vm339_vm6, %v336_v55 }
 0x42e   :  { %v376_v56 = vpop.f32.mrf.mxu0 }
 0x42f   :  { %v383_v57 = vmul.f32 2.0, %v376_v56 }
 0x430   :  { %v2500_v58 = vpop.f32.mrf.mxu0 }
 0x431   :  { %v385_v59 = vsub.f32 %v383_v57, %v265_v33 }
 0x432   :  { %v379_v60 = vpop.f32.mrf.mxu0 }
 0x433   :  { %v384_v61 = vmul.f32 2.0, %v379_v60  ;;  %v2322_v62 = vpack.c.bf16 %v385_v59, %v385_v59 }
 0x434   :  { %v2501_v63 = vpop.f32.mrf.mxu0 }
 0x435   :  { %v386_v1 = vsub.f32 %v384_v61, %v266_v38  ;;  %393 = vrot.lane.b32.xlu0 %v2322_v62, %s2825_s20 }
 0x437   :  { %v387_v2 = vpack.c.bf16 %v386_v1, %v385_v59  ;;  %v2323_v3 = vpack.c.bf16 %v386_v1, %v386_v1 }
 0x439   :  { %395 = vrot.lane.b32.xlu1 %v2323_v3, %s2825_s20  ;;  %2503 = vmatpush3.bf16.msra.mxu1 %v387_v2 }
 0x43a   :  { %2514 = vmatprep.subr.bf16.mxu1 %v2819_v0 }
 0x43c   :  { %2505 = vmatmul.mubr.msk.bf16.vlgmr.msra.gmra.mxu1 %vm102_vm1, %v2891_v4 }
 0x43d   :  { %2516 = vmatprep.mubr.msk.bf16.mxu1 %vm2820_vm0, %v2819_v0 }
 0x4a7   :  { %v394_v5 = vpop.permute.xlu0 %393 }
 0x4a8   :  { %400 = vst.msk [vmem:[#allocation2] sm:$0xf] %vm399_vm7, %v394_v5 }
 0x4ab   :  { %v396_v6 = vpop.permute.xlu1 %395 }
 0x4ac   :  { %401 = vst.msk [vmem:[#allocation2 + $0x8] sm:$0xf] %vm399_vm7, %v396_v6 }
 0x4fc   :  { %v436_v7 = vpop.f32.mrf.mxu1 }
 0x4fd   :  { %v443_v8 = vmul.f32 2.0, %v436_v7 }
 0x4fe   :  { %v2506_v9 = vpop.f32.mrf.mxu1 }
 0x4ff   :  { %v445_v10 = vsub.f32 %v443_v8, %v325_v46 }
 0x500   :  { %v439_v11 = vpop.f32.mrf.mxu1 }
 0x501   :  { %v444_v12 = vmul.f32 2.0, %v439_v11  ;;  %v2324_v13 = vpack.c.bf16 %v445_v10, %v445_v10 }
 0x502   :  { %v2507_v14 = vpop.f32.mrf.mxu1 }
 0x503   :  { %v446_v15 = vsub.f32 %v444_v12, %v326_v51  ;;  %453 = vrot.lane.b32.xlu0 %v2324_v13, %s2826_s21 }
 0x505   :  { %v447_v16 = vpack.c.bf16 %v446_v15, %v445_v10  ;;  %v2325_v17 = vpack.c.bf16 %v446_v15, %v446_v15 }
 0x507   :  { %455 = vrot.lane.b32.xlu1 %v2325_v17, %s2826_s21  ;;  %2509 = vmatpush3.bf16.msra.mxu0 %v447_v16 }
 0x508   :  { %2520 = vmatprep.subr.bf16.mxu0 %v2819_v0 }
 0x50a   :  { %2511 = vmatmul.mubr.msk.bf16.vlgmr.msra.gmra.mxu0 %vm102_vm1, %v2891_v4 }
 0x50b   :  { %2522 = vmatprep.mubr.msk.bf16.mxu0 %vm2820_vm0, %v2819_v0 }
 0x575   :  { %v454_v18 = vpop.permute.xlu0 %453 }
 0x576   :  { %460 = vst.msk [vmem:[#allocation2] sm:$0xf] %vm459_vm8, %v454_v18 }
 0x579   :  { %v456_v19 = vpop.permute.xlu1 %455 }
 0x57a   :  { %461 = vst.msk [vmem:[#allocation2 + $0x8] sm:$0xf] %vm459_vm8, %v456_v19 }
 0x5ca   :  { %v496_v20 = vpop.f32.mrf.mxu0 }
 0x5cb   :  { %v503_v21 = vmul.f32 2.0, %v496_v20 }
 0x5cc   :  { %v2512_v22 = vpop.f32.mrf.mxu0 }
 0x5cd   :  { %v505_v23 = vsub.f32 %v503_v21, %v385_v59 }
 0x5ce   :  { %v499_v24 = vpop.f32.mrf.mxu0 }
 0x5cf   :  { %v504_v25 = vmul.f32 2.0, %v499_v24  ;;  %v2326_v26 = vpack.c.bf16 %v505_v23, %v505_v23 }
 0x5d0   :  { %v2513_v27 = vpop.f32.mrf.mxu0 }
 0x5d1   :  { %v506_v28 = vsub.f32 %v504_v25, %v386_v1  ;;  %513 = vrot.lane.b32.xlu0 %v2326_v26, %s2827_s22 }
 0x5d3   :  { %v507_v29 = vpack.c.bf16 %v506_v28, %v505_v23  ;;  %v2327_v30 = vpack.c.bf16 %v506_v28, %v506_v28 }
 0x5d5   :  { %515 = vrot.lane.b32.xlu1 %v2327_v30, %s2827_s22  ;;  %2515 = vmatpush3.bf16.msra.mxu1 %v507_v29 }
 0x5d6   :  { %2526 = vmatprep.subr.bf16.mxu1 %v2819_v0 }
 0x5d8   :  { %2517 = vmatmul.mubr.msk.bf16.vlgmr.msra.gmra.mxu1 %vm102_vm1, %v2891_v4 }
 0x5d9   :  { %2528 = vmatprep.mubr.msk.bf16.mxu1 %vm2820_vm0, %v2819_v0 }
 0x643   :  { %v514_v31 = vpop.permute.xlu0 %513 }
 0x644   :  { %520 = vst.msk [vmem:[#allocation2] sm:$0xf] %vm519_vm9, %v514_v31 }
 0x647   :  { %v516_v32 = vpop.permute.xlu1 %515 }
 0x648   :  { %521 = vst.msk [vmem:[#allocation2 + $0x8] sm:$0xf] %vm519_vm9, %v516_v32 }
 0x698   :  { %v556_v33 = vpop.f32.mrf.mxu1 }
 0x699   :  { %v563_v34 = vmul.f32 2.0, %v556_v33 }
 0x69a   :  { %v2518_v35 = vpop.f32.mrf.mxu1 }
 0x69b   :  { %v565_v36 = vsub.f32 %v563_v34, %v445_v10 }
 0x69c   :  { %v559_v37 = vpop.f32.mrf.mxu1 }
 0x69d   :  { %v2328_v38 = vpack.c.bf16 %v565_v36, %v565_v36  ;;  %v564_v39 = vmul.f32 2.0, %v559_v37 }
 0x69e   :  { %v2519_v40 = vpop.f32.mrf.mxu1 }
 0x69f   :  { %575 = vst.msk [vmem:[#allocation2 + $0x4] sm:$0xf] %vm94_vm2, %v2328_v38  ;;  %v566_v41 = vsub.f32 %v564_v39, %v446_v15 }
 0x6a1   :  { %v567_v42 = vpack.c.bf16 %v566_v41, %v565_v36  ;;  %v2329_v43 = vpack.c.bf16 %v566_v41, %v566_v41 }
 0x6a3   :  { %576 = vst.msk [vmem:[#allocation2 + $0xc] sm:$0xf] %vm94_vm2, %v2329_v43  ;;  %2521 = vmatpush3.bf16.msra.mxu0 %v567_v42 }
 0x6a4   :  { %2532 = vmatprep.subr.bf16.mxu0 %v2819_v0 }
 0x6a6   :  { %2523 = vmatmul.mubr.msk.bf16.vlgmr.msra.gmra.mxu0 %vm102_vm1, %v2891_v4 }
 0x6a7   :  { %2534 = vmatprep.mubr.msk.bf16.mxu0 %vm2820_vm0, %v2819_v0 }
 0x766   :  { %v611_v44 = vpop.f32.mrf.mxu0 }
 0x767   :  { %v618_v45 = vmul.f32 2.0, %v611_v44 }
 0x768   :  { %v2524_v46 = vpop.f32.mrf.mxu0 }
 0x769   :  { %v620_v47 = vsub.f32 %v618_v45, %v505_v23  ;;  %v2659_v45 = vld [vmem:[#allocation8 + $0x78] sm:$0xff]  }
 0x76a   :  { %v614_v48 = vpop.f32.mrf.mxu0  ;;  %v2660_v46 = vld [vmem:[#allocation8 + $0x38] sm:$0xff]  }
 0x76b   :  { %v619_v49 = vmul.f32 2.0, %v614_v48  ;;  %v2330_v50 = vpack.c.bf16 %v620_v47, %v620_v47  ;;  %v2662_v48 = vld [vmem:[#allocation8 + $0x30] sm:$0xff]  }
 0x76c   :  { %v2525_v51 = vpop.f32.mrf.mxu0 }
 0x76d   :  { %v621_v52 = vsub.f32 %v619_v49, %v506_v28  ;;  %628 = vrot.lane.b32.xlu0 %v2330_v50, %s2822_s2  ;;  %v2663_v49 = vld [vmem:[#allocation8 + $0x68] sm:$0xff]   ;;  %v2665_v51 = vld [vmem:[#allocation8 + $0x60] sm:$0xff]  }
 0x76e   :  { %v2664_v50 = vld [vmem:[#allocation8 + $0x28] sm:$0xff]  }
 0x76f   :  { %v622_v53 = vpack.c.bf16 %v621_v52, %v620_v47  ;;  %v2331_v54 = vpack.c.bf16 %v621_v52, %v621_v52 }
 0x771   :  { %630 = vrot.lane.b32.xlu1 %v2331_v54, %s2822_s2  ;;  %2527 = vmatpush3.bf16.msra.mxu1 %v622_v53  ;;  %v2667_v53 = vld [vmem:[#allocation8 + $0x58] sm:$0xff]  }
 0x772   :  { %2538 = vmatprep.subr.bf16.mxu1 %v2819_v0 }
 0x774   :  { %2529 = vmatmul.mubr.msk.bf16.vlgmr.msra.gmra.mxu1 %vm102_vm1, %v2891_v4 }
 0x775   :  { %2540 = vmatprep.mubr.msk.bf16.mxu1 %vm2820_vm0, %v2819_v0 }
 0x7df   :  { %v629_v55 = vpop.permute.xlu0 %628 }
 0x7e0   :  { %634 = vst.msk [vmem:[#allocation2 + $0x4] sm:$0xf] %vm159_vm3, %v629_v55 }
 0x7e3   :  { %v631_v56 = vpop.permute.xlu1 %630 }
 0x7e4   :  { %635 = vst.msk [vmem:[#allocation2 + $0xc] sm:$0xf] %vm159_vm3, %v631_v56  ;;  %v2668_v56 = vld [vmem:[#allocation8 + $0x18] sm:$0xff]  }
 0x834   :  { %v670_v57 = vpop.f32.mrf.mxu1 }
 0x835   :  { %v677_v58 = vmul.f32 2.0, %v670_v57  ;;  %v2669_v57 = vld [vmem:[#allocation8 + $0x50] sm:$0xff]  }
 0x836   :  { %v2530_v59 = vpop.f32.mrf.mxu1 }
 0x837   :  { %v679_v60 = vsub.f32 %v677_v58, %v565_v36  ;;  %v2670_v58 = vld [vmem:[#allocation8 + $0x10] sm:$0xff]   ;;  %v2671_v59 = vld [vmem:[#allocation8 + $0x48] sm:$0xff]  }
 0x838   :  { %v673_v61 = vpop.f32.mrf.mxu1 }
 0x839   :  { %v678_v62 = vmul.f32 2.0, %v673_v61  ;;  %v2332_v63 = vpack.c.bf16 %v679_v60, %v679_v60  ;;  %v2672_v61 = vld [vmem:[#allocation8 + $0x8] sm:$0xff]  }
 0x83a   :  { %v2531_v1 = vpop.f32.mrf.mxu1 }
 0x83b   :  { %v680_v2 = vsub.f32 %v678_v62, %v566_v41  ;;  %687 = vrot.lane.b32.xlu0 %v2332_v63, %s2823_s4 }
 0x83d   :  { %v681_v3 = vpack.c.bf16 %v680_v2, %v679_v60  ;;  %v2333_v5 = vpack.c.bf16 %v680_v2, %v680_v2 }
 0x83f   :  { %689 = vrot.lane.b32.xlu1 %v2333_v5, %s2823_s4  ;;  %2533 = vmatpush3.bf16.msra.mxu0 %v681_v3  ;;  %v2674_v5 = vld [vmem:[#allocation8] sm:$0xff]  }
 0x840   :  { %2544 = vmatprep.subr.bf16.mxu0 %v2819_v0 }
 0x842   :  { %2535 = vmatmul.mubr.msk.bf16.vlgmr.msra.gmra.mxu0 %vm102_vm1, %v2891_v4 }
 0x843   :  { %2546 = vmatprep.mubr.msk.bf16.mxu0 %vm2820_vm0, %v2819_v0 }
 0x8ad   :  { %v688_v6 = vpop.permute.xlu0 %687 }
 0x8ae   :  { %693 = vst.msk [vmem:[#allocation2 + $0x4] sm:$0xf] %vm219_vm4, %v688_v6 }
 0x8b1   :  { %v690_v7 = vpop.permute.xlu1 %689 }
 0x8b2   :  { %694 = vst.msk [vmem:[#allocation2 + $0xc] sm:$0xf] %vm219_vm4, %v690_v7 }
 0x902   :  { %v729_v8 = vpop.f32.mrf.mxu0 }
 0x903   :  { %v736_v9 = vmul.f32 2.0, %v729_v8 }
 0x904   :  { %v2536_v10 = vpop.f32.mrf.mxu0 }
 0x905   :  { %v738_v11 = vsub.f32 %v736_v9, %v620_v47  ;;  %v2661_v47 = vld [vmem:[#allocation8 + $0x70] sm:$0xff]  }
 0x906   :  { %v732_v12 = vpop.f32.mrf.mxu0 }
 0x907   :  { %v737_v13 = vmul.f32 2.0, %v732_v12  ;;  %v2334_v14 = vpack.c.bf16 %v738_v11, %v738_v11 }
 0x908   :  { %v2537_v15 = vpop.f32.mrf.mxu0 }
 0x909   :  { %v739_v16 = vsub.f32 %v737_v13, %v621_v52  ;;  %746 = vrot.lane.b32.xlu0 %v2334_v14, %s2824_s19  ;;  %v2666_v52 = vld [vmem:[#allocation8 + $0x20] sm:$0xff]  }
 0x90b   :  { %v740_v17 = vpack.c.bf16 %v739_v16, %v738_v11  ;;  %v2335_v18 = vpack.c.bf16 %v739_v16, %v739_v16 }
 0x90d   :  { %748 = vrot.lane.b32.xlu1 %v2335_v18, %s2824_s19  ;;  %2539 = vmatpush3.bf16.msra.mxu1 %v740_v17  ;;  %v2230_v18 = vld [vmem:[%s3184_s3] ss:$0 sm:$0xff] }
 0x90e   :  { %2550 = vmatprep.subr.bf16.mxu1 %v2819_v0 }
 0x910   :  { %2541 = vmatmul.mubr.msk.bf16.vlgmr.msra.gmra.mxu1 %vm102_vm1, %v2891_v4 }
 0x911   :  { %2552 = vmatprep.mubr.msk.bf16.mxu1 %vm2820_vm0, %v2819_v0 }
 0x97b   :  { %v747_v19 = vpop.permute.xlu0 %746 }
 0x97c   :  { %752 = vst.msk [vmem:[#allocation2 + $0x4] sm:$0xf] %vm279_vm5, %v747_v19 }
 0x97f   :  { %v749_v20 = vpop.permute.xlu1 %748 }
 0x980   :  { %753 = vst.msk [vmem:[#allocation2 + $0xc] sm:$0xf] %vm279_vm5, %v749_v20 }
 0x9d0   :  { %v788_v21 = vpop.f32.mrf.mxu1 }
 0x9d1   :  { %v795_v22 = vmul.f32 2.0, %v788_v21 }
 0x9d2   :  { %v2542_v23 = vpop.f32.mrf.mxu1 }
 0x9d3   :  { %v2997_v24 = vsub.f32 %v795_v22, %v679_v60 }
 0x9d4   :  { %v791_v25 = vpop.f32.mrf.mxu1 }
 0x9d5   :  { %v796_v26 = vmul.f32 2.0, %v791_v25  ;;  %v2336_v27 = vpack.c.bf16 %v2997_v24, %v2997_v24 }
 0x9d6   :  { %v2543_v28 = vpop.f32.mrf.mxu1 }
 0x9d7   :  { %v3001_v29 = vsub.f32 %v796_v26, %v680_v2  ;;  %805 = vrot.lane.b32.xlu0 %v2336_v27, %s2815_s7  ;;  %v2673_v2 = vld [vmem:[#allocation8 + $0x40] sm:$0xff]  }
 0x9d9   :  { %v799_v30 = vpack.c.bf16 %v3001_v29, %v2997_v24  ;;  %v2337_v31 = vpack.c.bf16 %v3001_v29, %v3001_v29 }
 0x9db   :  { %807 = vrot.lane.b32.xlu1 %v2337_v31, %s2815_s7  ;;  %2545 = vmatpush3.bf16.msra.mxu0 %v799_v30 }
 0x9dc   :  { %2400 = vmatprep.subr.bf16.mxu0 %v2659_v45 }
 0x9de   :  { %2547 = vmatmul.mubr.msk.bf16.vlgmr.msra.gmra.mxu0 %vm102_vm1, %v2891_v4 }
 0x9df   :  { %2401 = vmatpush3.bf16.msra.mxu0 %v2660_v46 }
 0x9e0   :  { %2402 = vmatprep.subr.bf16.mxu0 %v2661_v47 }
 0x9e3   :  { %2403 = vmatpush3.bf16.msra.mxu0 %v2662_v48 }
 0x9e4   :  { %2404 = vmatprep.subr.bf16.mxu0 %v2663_v49 }
 0x9e7   :  { %2405 = vmatpush3.bf16.msra.mxu0 %v2664_v50 }
 0x9e8   :  { %2406 = vmatprep.subr.bf16.mxu0 %v2665_v51 }
 0x9eb   :  { %2407 = vmatpush3.bf16.msra.mxu0 %v2666_v52 }
 0x9ec   :  { %2408 = vmatprep.subr.bf16.mxu0 %v2667_v53 }
 0x9ef   :  { %2409 = vmatpush3.bf16.msra.mxu0 %v2668_v56 }
 0x9f0   :  { %2410 = vmatprep.subr.bf16.mxu0 %v2669_v57 }
 0x9f3   :  { %2411 = vmatpush3.bf16.msra.mxu0 %v2670_v58 }
 0x9f4   :  { %2412 = vmatprep.subr.bf16.mxu0 %v2671_v59 }
 0x9f7   :  { %2413 = vmatpush3.bf16.msra.mxu0 %v2672_v61 }
 0x9f8   :  { %2414 = vmatprep.subr.bf16.mxu0 %v2673_v2 }
 0x9fb   :  { %2415 = vmatpush3.bf16.msra.mxu0 %v2674_v5 }
 0x9fc   :  { %2580 = vmatprep.subr.bf16.mxu0 %v2819_v0 }
 0xa49   :  { %v806_v32 = vpop.permute.xlu0 %805 }
 0xa4a   :  { %811 = vst.msk [vmem:[#allocation2 + $0x4] sm:$0xf] %vm339_vm6, %v806_v32 }
 0xa4d   :  { %v808_v33 = vpop.permute.xlu1 %807 }
 0xa4e   :  { %812 = vst.msk [vmem:[#allocation2 + $0xc] sm:$0xf] %vm339_vm6, %v808_v33 }
 0xa9e   :  { %v847_v34 = vpop.f32.mrf.mxu0 }
 0xa9f   :  { %v854_v35 = vmul.f32 2.0, %v847_v34 }
 0xaa0   :  { %v2548_v36 = vpop.f32.mrf.mxu0 }
 0xaa1   :  { %v856_v37 = vsub.f32 %v854_v35, %v738_v11 }
 0xaa2   :  { %v850_v38 = vpop.f32.mrf.mxu0 }
 0xaa3   :  { %v855_v39 = vmul.f32 2.0, %v850_v38  ;;  %v2338_v40 = vpack.c.bf16 %v856_v37, %v856_v37 }
 0xaa4   :  { %v2549_v41 = vpop.f32.mrf.mxu0 }
 0xaa5   :  { %v857_v42 = vsub.f32 %v855_v39, %v739_v16  ;;  %864 = vrot.lane.b32.xlu0 %v2338_v40, %s2825_s20 }
 0xaa7   :  { %v858_v43 = vpack.c.bf16 %v857_v42, %v856_v37  ;;  %v2339_v44 = vpack.c.bf16 %v857_v42, %v857_v42 }
 0xaa9   :  { %866 = vrot.lane.b32.xlu1 %v2339_v44, %s2825_s20  ;;  %2551 = vmatpush3.bf16.msra.mxu1 %v858_v43 }
 0xaaa   :  { %2556 = vmatprep.subr.bf16.mxu1 %v2819_v0 }
 0xaac   :  { %2553 = vmatmul.mubr.msk.bf16.vlgmr.msra.gmra.mxu1 %vm102_vm1, %v2891_v4 }
 0xaad   :  { %2558 = vmatprep.mubr.msk.bf16.mxu1 %vm2820_vm0, %v2819_v0 }
 0xb17   :  { %v865_v54 = vpop.permute.xlu0 %864 }
 0xb18   :  { %870 = vst.msk [vmem:[#allocation2 + $0x4] sm:$0xf] %vm399_vm7, %v865_v54 }
 0xb1b   :  { %v867_v55 = vpop.permute.xlu1 %866 }
 0xb1c   :  { %871 = vst.msk [vmem:[#allocation2 + $0xc] sm:$0xf] %vm399_vm7, %v867_v55 }
 0xb6c   :  { %v906_v60 = vpop.f32.mrf.mxu1 }
 0xb6d   :  { %v913_v62 = vmul.f32 2.0, %v906_v60 }
 0xb6e   :  { %v2554_v63 = vpop.f32.mrf.mxu1 }
 0xb6f   :  { %v915_v1 = vsub.f32 %v913_v62, %v2997_v24 }
 0xb70   :  { %v909_v3 = vpop.f32.mrf.mxu1 }
 0xb71   :  { %v2340_v6 = vpack.c.bf16 %v915_v1, %v915_v1  ;;  %v914_v7 = vmul.f32 2.0, %v909_v3 }
 0xb72   :  { %v2555_v8 = vpop.f32.mrf.mxu1 }
 0xb73   :  { %v916_v9 = vsub.f32 %v914_v7, %v3001_v29  ;;  %923 = vrot.lane.b32.xlu0 %v2340_v6, %s2826_s21 }
 0xb75   :  { %v2341_v10 = vpack.c.bf16 %v916_v9, %v916_v9 }
 0xb77   :  { %925 = vrot.lane.b32.xlu1 %v2341_v10, %s2826_s21 }
 0xbe5   :  { %v924_v11 = vpop.permute.xlu0 %923 }
 0xbe6   :  { %929 = vst.msk [vmem:[#allocation2 + $0x4] sm:$0xf] %vm459_vm8, %v924_v11 }
 0xbe9   :  { %v926_v12 = vpop.permute.xlu1 %925 }
 0xbea   :  { %930 = vst.msk [vmem:[#allocation2 + $0xc] sm:$0xf] %vm459_vm8, %v926_v12 }
 0xbed   :  { %v931_v13 = vld [vmem:[#allocation2] sm:$0xff] }
 0xbf1   :  { %v932_v14 = vld [vmem:[#allocation2 + $0x8] sm:$0xff] }
 0xbf2   :  { %v2232_v15 = vcombine.high %v931_v13, %v932_v14  ;;  %v2231_v16 = vcombine.low %v931_v13, %v932_v14 }
 0xbf4   :  { %1110 = vmatprep.mubr.bf16.mxu0 %v2232_v15 }
 0xbf5   :  { %1111 = vmatmul.mubr.bf16.vlgmr.msra.gmra.mxu0 %v2231_v16 }
 0xbf6   :  { %2582 = vmatprep.mubr.msk.bf16.mxu0 %vm2820_vm0, %v2819_v0 }
 0xcb5   :  { %v2416_v17 = vpop.f32.mrf.mxu0 }
 0xcb7   :  { %v2417_v19 = vpop.f32.mrf.mxu0 }
 0xcb8   :  { %v2418_v20 = vadd.f32 %v2417_v19, %v2416_v17 }
 0xcb9   :  { %v2419_v21 = vpop.f32.mrf.mxu0 }
 0xcba   :  { %v1113_v22 = vadd.f32 %v2418_v20, %v2230_v18 }
 0xcbb   :  { %v2420_v23 = vpop.f32.mrf.mxu0 }
 0xcbc   :  { %v1119_v24 = vmax.f32 %v1113_v22, 0.0  ;;  %v2421_v25 = vadd.f32 %v2420_v23, %v2419_v21 }
 0xcbe   :  { %v2342_v26 = vpack.c.bf16 %v1119_v24, %v1119_v24  ;;  %v1116_v27 = vadd.f32 %v2421_v25, %v2230_v18 }
 0xcc0   :  { %1129 = vst.msk [vmem:[#allocation2] sm:$0xf] %vm94_vm2, %v2342_v26  ;;  %v1120_v28 = vmax.f32 %v1116_v27, 0.0  ;;  %v3080_v27 = vld [vmem:[#allocation3] sm:$0xff]  }
 0xcc2   :  { %v2343_v29 = vpack.c.bf16 %v1120_v28, %v1120_v28  ;;  %v1121_v30 = vpack.c.bf16 %v1120_v28, %v1119_v24 }
 0xcc4   :  { %1130 = vst.msk [vmem:[#allocation2 + $0x8] sm:$0xf] %vm94_vm2, %v2343_v29  ;;  %2557 = vmatpush3.bf16.msra.mxu1 %v1121_v30 }
 0xcc5   :  { %2562 = vmatprep.subr.bf16.mxu1 %v2819_v0 }
 0xcc7   :  { %2559 = vmatmul.mubr.msk.bf16.vlgmr.msra.gmra.mxu1 %vm102_vm1, %v2891_v4 }
 0xcc8   :  { %2564 = vmatprep.mubr.msk.bf16.mxu1 %vm2820_vm0, %v2819_v0 }
 0xd87   :  { %v1165_v31 = vpop.f32.mrf.mxu1 }
 0xd88   :  { %v2344_v32 = vpack.c.bf16 %v1165_v31, %v1165_v31 }
 0xd89   :  { %v2560_v33 = vpop.f32.mrf.mxu1 }
 0xd8a   :  { %1178 = vrot.lane.b32.xlu0 %v2344_v32, %s2822_s2 }
 0xd8b   :  { %v1168_v34 = vpop.f32.mrf.mxu1 }
 0xd8c   :  { %v1172_v35 = vpack.c.bf16 %v1168_v34, %v1165_v31  ;;  %v2345_v36 = vpack.c.bf16 %v1168_v34, %v1168_v34 }
 0xd8d   :  { %v2561_v37 = vpop.f32.mrf.mxu1 }
 0xd8e   :  { %1180 = vrot.lane.b32.xlu1 %v2345_v36, %s2822_s2  ;;  %2563 = vmatpush3.bf16.msra.mxu1 %v1172_v35 }
 0xd8f   :  { %2568 = vmatprep.subr.bf16.mxu1 %v2819_v0 }
 0xd91   :  { %2565 = vmatmul.mubr.msk.bf16.vlgmr.msra.gmra.mxu1 %vm102_vm1, %v2891_v4 }
 0xd92   :  { %2570 = vmatprep.mubr.msk.bf16.mxu1 %vm2820_vm0, %v2819_v0 }
 0xdfc   :  { %v1179_v38 = vpop.permute.xlu0 %1178 }
 0xdfd   :  { %1184 = vst.msk [vmem:[#allocation2] sm:$0xf] %vm159_vm3, %v1179_v38 }
 0xe00   :  { %v1181_v39 = vpop.permute.xlu1 %1180 }
 0xe01   :  { %1185 = vst.msk [vmem:[#allocation2 + $0x8] sm:$0xf] %vm159_vm3, %v1181_v39 }
 0xe51   :  { %v1220_v40 = vpop.f32.mrf.mxu1 }
 0xe52   :  { %v1227_v41 = vmul.f32 2.0, %v1220_v40 }
 0xe53   :  { %v2566_v42 = vpop.f32.mrf.mxu1 }
 0xe54   :  { %v1229_v43 = vsub.f32 %v1227_v41, %v1119_v24 }
 0xe55   :  { %v1223_v44 = vpop.f32.mrf.mxu1 }
 0xe56   :  { %v1228_v45 = vmul.f32 2.0, %v1223_v44  ;;  %v2346_v46 = vpack.c.bf16 %v1229_v43, %v1229_v43 }
 0xe57   :  { %v2567_v47 = vpop.f32.mrf.mxu1 }
 0xe58   :  { %v1230_v48 = vsub.f32 %v1228_v45, %v1120_v28  ;;  %1237 = vrot.lane.b32.xlu0 %v2346_v46, %s2823_s4 }
 0xe5a   :  { %v1231_v49 = vpack.c.bf16 %v1230_v48, %v1229_v43  ;;  %v2347_v50 = vpack.c.bf16 %v1230_v48, %v1230_v48 }
 0xe5c   :  { %1239 = vrot.lane.b32.xlu1 %v2347_v50, %s2823_s4  ;;  %2569 = vmatpush3.bf16.msra.mxu1 %v1231_v49 }
 0xe5d   :  { %2574 = vmatprep.subr.bf16.mxu1 %v2819_v0 }
 0xe5f   :  { %2571 = vmatmul.mubr.msk.bf16.vlgmr.msra.gmra.mxu1 %vm102_vm1, %v2891_v4 }
 0xe60   :  { %2576 = vmatprep.mubr.msk.bf16.mxu1 %vm2820_vm0, %v2819_v0 }
 0xeca   :  { %v1238_v51 = vpop.permute.xlu0 %1237 }
 0xecb   :  { %1243 = vst.msk [vmem:[#allocation2] sm:$0xf] %vm219_vm4, %v1238_v51 }
 0xece   :  { %v1240_v52 = vpop.permute.xlu1 %1239 }
 0xecf   :  { %1244 = vst.msk [vmem:[#allocation2 + $0x8] sm:$0xf] %vm219_vm4, %v1240_v52 }
 0xf1f   :  { %v1279_v53 = vpop.f32.mrf.mxu1 }
 0xf20   :  { %v1286_v54 = vmul.f32 2.0, %v1279_v53 }
 0xf21   :  { %v2572_v55 = vpop.f32.mrf.mxu1 }
 0xf22   :  { %v1288_v56 = vsub.f32 %v1286_v54, %v1165_v31 }
 0xf23   :  { %v1282_v57 = vpop.f32.mrf.mxu1 }
 0xf24   :  { %v1287_v58 = vmul.f32 2.0, %v1282_v57  ;;  %v2348_v59 = vpack.c.bf16 %v1288_v56, %v1288_v56 }
 0xf25   :  { %v2573_v60 = vpop.f32.mrf.mxu1 }
 0xf26   :  { %v1289_v61 = vsub.f32 %v1287_v58, %v1168_v34  ;;  %1296 = vrot.lane.b32.xlu0 %v2348_v59, %s2824_s19 }
 0xf28   :  { %v1290_v62 = vpack.c.bf16 %v1289_v61, %v1288_v56  ;;  %v2349_v63 = vpack.c.bf16 %v1289_v61, %v1289_v61 }
 0xf2a   :  { %1298 = vrot.lane.b32.xlu1 %v2349_v63, %s2824_s19  ;;  %2575 = vmatpush3.bf16.msra.mxu1 %v1290_v62 }
 0xf2b   :  { %2586 = vmatprep.subr.bf16.mxu1 %v2819_v0 }
 0xf2d   :  { %2577 = vmatmul.mubr.msk.bf16.vlgmr.msra.gmra.mxu1 %vm102_vm1, %v2891_v4 }
 0xf2e   :  { %2588 = vmatprep.mubr.msk.bf16.mxu1 %vm2820_vm0, %v2819_v0 }
 0xf98   :  { %v1297_v1 = vpop.permute.xlu0 %1296 }
 0xf99   :  { %1302 = vst.msk [vmem:[#allocation2] sm:$0xf] %vm279_vm5, %v1297_v1 }
 0xf9c   :  { %v1299_v2 = vpop.permute.xlu1 %1298 }
 0xf9d   :  { %1303 = vst.msk [vmem:[#allocation2 + $0x8] sm:$0xf] %vm279_vm5, %v1299_v2 }
 0xfed   :  { %v1338_v3 = vpop.f32.mrf.mxu1 }
 0xfee   :  { %v1345_v5 = vmul.f32 2.0, %v1338_v3 }
 0xfef   :  { %v2578_v6 = vpop.f32.mrf.mxu1 }
 0xff0   :  { %v1347_v7 = vsub.f32 %v1345_v5, %v1229_v43 }
 0xff1   :  { %v1341_v8 = vpop.f32.mrf.mxu1 }
 0xff2   :  { %v1346_v9 = vmul.f32 2.0, %v1341_v8  ;;  %v2350_v10 = vpack.c.bf16 %v1347_v7, %v1347_v7 }
 0xff3   :  { %v2579_v11 = vpop.f32.mrf.mxu1 }
 0xff4   :  { %v1348_v12 = vsub.f32 %v1346_v9, %v1230_v48  ;;  %1355 = vrot.lane.b32.xlu0 %v2350_v10, %s2815_s7 }
 0xff6   :  { %v1349_v13 = vpack.c.bf16 %v1348_v12, %v1347_v7  ;;  %v2351_v14 = vpack.c.bf16 %v1348_v12, %v1348_v12 }
 0xff8   :  { %1357 = vrot.lane.b32.xlu1 %v2351_v14, %s2815_s7  ;;  %2581 = vmatpush3.bf16.msra.mxu0 %v1349_v13 }
 0xff9   :  { %2592 = vmatprep.subr.bf16.mxu0 %v2819_v0 }
 0xffb   :  { %2583 = vmatmul.mubr.msk.bf16.vlgmr.msra.gmra.mxu0 %vm102_vm1, %v2891_v4 }
 0xffc   :  { %2594 = vmatprep.mubr.msk.bf16.mxu0 %vm2820_vm0, %v2819_v0 }
0x1066   :  { %v1356_v15 = vpop.permute.xlu0 %1355 }
0x1067   :  { %1361 = vst.msk [vmem:[#allocation2] sm:$0xf] %vm339_vm6, %v1356_v15 }
0x106a   :  { %v1358_v16 = vpop.permute.xlu1 %1357 }
0x106b   :  { %1362 = vst.msk [vmem:[#allocation2 + $0x8] sm:$0xf] %vm339_vm6, %v1358_v16 }
0x10bb   :  { %v1397_v17 = vpop.f32.mrf.mxu0 }
0x10bc   :  { %v1404_v18 = vmul.f32 2.0, %v1397_v17 }
0x10bd   :  { %v2584_v19 = vpop.f32.mrf.mxu0 }
0x10be   :  { %v1406_v20 = vsub.f32 %v1404_v18, %v1288_v56 }
0x10bf   :  { %v1400_v21 = vpop.f32.mrf.mxu0 }
0x10c0   :  { %v1405_v22 = vmul.f32 2.0, %v1400_v21  ;;  %v2352_v23 = vpack.c.bf16 %v1406_v20, %v1406_v20 }
0x10c1   :  { %v2585_v24 = vpop.f32.mrf.mxu0 }
0x10c2   :  { %v1407_v25 = vsub.f32 %v1405_v22, %v1289_v61  ;;  %1414 = vrot.lane.b32.xlu0 %v2352_v23, %s2825_s20 }
0x10c4   :  { %v1408_v4 = vpack.c.bf16 %v1407_v25, %v1406_v20  ;;  %v2353_v26 = vpack.c.bf16 %v1407_v25, %v1407_v25 }
0x10c6   :  { %1416 = vrot.lane.b32.xlu1 %v2353_v26, %s2825_s20  ;;  %2587 = vmatpush3.bf16.msra.mxu1 %v1408_v4 }
0x10c7   :  { %2598 = vmatprep.subr.bf16.mxu1 %v2819_v0 }
0x10c9   :  { %2589 = vmatmul.mubr.msk.bf16.vlgmr.msra.gmra.mxu1 %vm102_vm1, %v3080_v27 }
0x10ca   :  { %2600 = vmatprep.mubr.msk.bf16.mxu1 %vm2820_vm0, %v2819_v0 }
0x1134   :  { %v1415_v28 = vpop.permute.xlu0 %1414 }
0x1135   :  { %1420 = vst.msk [vmem:[#allocation2] sm:$0xf] %vm399_vm7, %v1415_v28 }
0x1138   :  { %v1417_v29 = vpop.permute.xlu1 %1416 }
0x1139   :  { %1421 = vst.msk [vmem:[#allocation2 + $0x8] sm:$0xf] %vm399_vm7, %v1417_v29 }
0x1189   :  { %v1456_v30 = vpop.f32.mrf.mxu1 }
0x118a   :  { %v1463_v31 = vmul.f32 2.0, %v1456_v30 }
0x118b   :  { %v2590_v32 = vpop.f32.mrf.mxu1 }
0x118c   :  { %v1465_v33 = vsub.f32 %v1463_v31, %v1347_v7 }
0x118d   :  { %v1459_v34 = vpop.f32.mrf.mxu1 }
0x118e   :  { %v1464_v35 = vmul.f32 2.0, %v1459_v34  ;;  %v2354_v36 = vpack.c.bf16 %v1465_v33, %v1465_v33 }
0x118f   :  { %v2591_v37 = vpop.f32.mrf.mxu1 }
0x1190   :  { %v1466_v38 = vsub.f32 %v1464_v35, %v1348_v12  ;;  %1473 = vrot.lane.b32.xlu0 %v2354_v36, %s2826_s21 }
0x1192   :  { %v1467_v39 = vpack.c.bf16 %v1466_v38, %v1465_v33  ;;  %v2355_v40 = vpack.c.bf16 %v1466_v38, %v1466_v38 }
0x1194   :  { %1475 = vrot.lane.b32.xlu1 %v2355_v40, %s2826_s21  ;;  %2593 = vmatpush3.bf16.msra.mxu0 %v1467_v39 }
0x1195   :  { %2604 = vmatprep.subr.bf16.mxu0 %v2819_v0 }
0x1197   :  { %2595 = vmatmul.mubr.msk.bf16.vlgmr.msra.gmra.mxu0 %vm102_vm1, %v3080_v27 }
0x1198   :  { %2606 = vmatprep.mubr.msk.bf16.mxu0 %vm2820_vm0, %v2819_v0 }
0x1202   :  { %v1474_v41 = vpop.permute.xlu0 %1473 }
0x1203   :  { %1479 = vst.msk [vmem:[#allocation2] sm:$0xf] %vm459_vm8, %v1474_v41 }
0x1206   :  { %v1476_v42 = vpop.permute.xlu1 %1475 }
0x1207   :  { %1480 = vst.msk [vmem:[#allocation2 + $0x8] sm:$0xf] %vm459_vm8, %v1476_v42 }
0x1257   :  { %v1515_v43 = vpop.f32.mrf.mxu0 }
0x1258   :  { %v1522_v44 = vmul.f32 2.0, %v1515_v43 }
0x1259   :  { %v2596_v45 = vpop.f32.mrf.mxu0 }
0x125a   :  { %v1524_v46 = vsub.f32 %v1522_v44, %v1406_v20 }
0x125b   :  { %v1518_v47 = vpop.f32.mrf.mxu0 }
0x125c   :  { %v1523_v48 = vmul.f32 2.0, %v1518_v47  ;;  %v2356_v49 = vpack.c.bf16 %v1524_v46, %v1524_v46 }
0x125d   :  { %v2597_v50 = vpop.f32.mrf.mxu0 }
0x125e   :  { %v1525_v51 = vsub.f32 %v1523_v48, %v1407_v25  ;;  %1532 = vrot.lane.b32.xlu0 %v2356_v49, %s2827_s22 }
0x1260   :  { %v1526_v52 = vpack.c.bf16 %v1525_v51, %v1524_v46  ;;  %v2357_v53 = vpack.c.bf16 %v1525_v51, %v1525_v51 }
0x1262   :  { %1534 = vrot.lane.b32.xlu1 %v2357_v53, %s2827_s22  ;;  %2599 = vmatpush3.bf16.msra.mxu1 %v1526_v52 }
0x1263   :  { %2610 = vmatprep.subr.bf16.mxu1 %v2819_v0 }
0x1265   :  { %2601 = vmatmul.mubr.msk.bf16.vlgmr.msra.gmra.mxu1 %vm102_vm1, %v3080_v27 }
0x1266   :  { %2612 = vmatprep.mubr.msk.bf16.mxu1 %vm2820_vm0, %v2819_v0 }
0x12d0   :  { %v1533_v54 = vpop.permute.xlu0 %1532 }
0x12d1   :  { %1538 = vst.msk [vmem:[#allocation2] sm:$0xf] %vm519_vm9, %v1533_v54 }
0x12d4   :  { %v1535_v55 = vpop.permute.xlu1 %1534 }
0x12d5   :  { %1539 = vst.msk [vmem:[#allocation2 + $0x8] sm:$0xf] %vm519_vm9, %v1535_v55 }
0x1325   :  { %v1574_v56 = vpop.f32.mrf.mxu1 }
0x1326   :  { %v1581_v57 = vmul.f32 2.0, %v1574_v56 }
0x1327   :  { %v2602_v58 = vpop.f32.mrf.mxu1 }
0x1328   :  { %v1583_v59 = vsub.f32 %v1581_v57, %v1465_v33 }
0x1329   :  { %v1577_v60 = vpop.f32.mrf.mxu1 }
0x132a   :  { %v2358_v61 = vpack.c.bf16 %v1583_v59, %v1583_v59  ;;  %v1582_v62 = vmul.f32 2.0, %v1577_v60 }
0x132b   :  { %v2603_v63 = vpop.f32.mrf.mxu1 }
0x132c   :  { %1593 = vst.msk [vmem:[#allocation2 + $0x4] sm:$0xf] %vm94_vm2, %v2358_v61  ;;  %v1584_v1 = vsub.f32 %v1582_v62, %v1466_v38 }
0x132e   :  { %v1585_v2 = vpack.c.bf16 %v1584_v1, %v1583_v59  ;;  %v2359_v3 = vpack.c.bf16 %v1584_v1, %v1584_v1 }
0x1330   :  { %1594 = vst.msk [vmem:[#allocation2 + $0xc] sm:$0xf] %vm94_vm2, %v2359_v3  ;;  %2605 = vmatpush3.bf16.msra.mxu0 %v1585_v2 }
0x1331   :  { %2616 = vmatprep.subr.bf16.mxu0 %v2819_v0 }
0x1333   :  { %2607 = vmatmul.mubr.msk.bf16.vlgmr.msra.gmra.mxu0 %vm102_vm1, %v3080_v27 }
0x1334   :  { %2618 = vmatprep.mubr.msk.bf16.mxu0 %vm2820_vm0, %v2819_v0 }
0x13f3   :  { %v1629_v5 = vpop.f32.mrf.mxu0 }
0x13f4   :  { %v1636_v6 = vmul.f32 2.0, %v1629_v5  ;;  %v2675_v5 = vld [vmem:[#allocation9 + $0x78] sm:$0xff]  }
0x13f5   :  { %v2608_v7 = vpop.f32.mrf.mxu0 }
0x13f6   :  { %v1638_v8 = vsub.f32 %v1636_v6, %v1524_v46  ;;  %v2676_v6 = vld [vmem:[#allocation9 + $0x38] sm:$0xff]   ;;  %v2677_v7 = vld [vmem:[#allocation9 + $0x70] sm:$0xff]  }
0x13f7   :  { %v1632_v9 = vpop.f32.mrf.mxu0 }
0x13f8   :  { %v1637_v10 = vmul.f32 2.0, %v1632_v9  ;;  %v2360_v11 = vpack.c.bf16 %v1638_v8, %v1638_v8  ;;  %v2679_v9 = vld [vmem:[#allocation9 + $0x68] sm:$0xff]  }
0x13f9   :  { %v2609_v12 = vpop.f32.mrf.mxu0 }
0x13fa   :  { %v1639_v13 = vsub.f32 %v1637_v10, %v1525_v51  ;;  %1646 = vrot.lane.b32.xlu0 %v2360_v11, %s2822_s2  ;;  %v2680_v10 = vld [vmem:[#allocation9 + $0x28] sm:$0xff]   ;;  %v2681_v11 = vld [vmem:[#allocation9 + $0x60] sm:$0xff]  }
0x13fb   :  { %v2682_v12 = vld [vmem:[#allocation9 + $0x20] sm:$0xff]  }
0x13fc   :  { %v1640_v14 = vpack.c.bf16 %v1639_v13, %v1638_v8  ;;  %v2361_v15 = vpack.c.bf16 %v1639_v13, %v1639_v13 }
0x13fe   :  { %1648 = vrot.lane.b32.xlu1 %v2361_v15, %s2822_s2  ;;  %2611 = vmatpush3.bf16.msra.mxu1 %v1640_v14  ;;  %v2684_v15 = vld [vmem:[#allocation9 + $0x18] sm:$0xff]  }
0x13ff   :  { %2622 = vmatprep.subr.bf16.mxu1 %v2819_v0 }
0x1401   :  { %2613 = vmatmul.mubr.msk.bf16.vlgmr.msra.gmra.mxu1 %vm102_vm1, %v3080_v27 }
0x1402   :  { %2624 = vmatprep.mubr.msk.bf16.mxu1 %vm2820_vm0, %v2819_v0 }
0x146c   :  { %v1647_v16 = vpop.permute.xlu0 %1646 }
0x146d   :  { %1652 = vst.msk [vmem:[#allocation2 + $0x4] sm:$0xf] %vm159_vm3, %v1647_v16  ;;  %v2685_v16 = vld [vmem:[#allocation9 + $0x50] sm:$0xff]  }
0x1470   :  { %v1649_v17 = vpop.permute.xlu1 %1648 }
0x1471   :  { %1653 = vst.msk [vmem:[#allocation2 + $0xc] sm:$0xf] %vm159_vm3, %v1649_v17  ;;  %v2686_v17 = vld [vmem:[#allocation9 + $0x10] sm:$0xff]  }
0x14c1   :  { %v1688_v18 = vpop.f32.mrf.mxu1 }
0x14c2   :  { %v1695_v19 = vmul.f32 2.0, %v1688_v18  ;;  %v2687_v18 = vld [vmem:[#allocation9 + $0x48] sm:$0xff]  }
0x14c3   :  { %v2614_v20 = vpop.f32.mrf.mxu1 }
0x14c4   :  { %v1697_v21 = vsub.f32 %v1695_v19, %v1583_v59  ;;  %v2688_v19 = vld [vmem:[#allocation9 + $0x8] sm:$0xff]   ;;  %v2689_v20 = vld [vmem:[#allocation9 + $0x40] sm:$0xff]  }
0x14c5   :  { %v1691_v22 = vpop.f32.mrf.mxu1 }
0x14c6   :  { %v1696_v23 = vmul.f32 2.0, %v1691_v22  ;;  %v2362_v24 = vpack.c.bf16 %v1697_v21, %v1697_v21 }
0x14c7   :  { %v2615_v25 = vpop.f32.mrf.mxu1 }
0x14c8   :  { %v1698_v4 = vsub.f32 %v1696_v23, %v1584_v1  ;;  %1705 = vrot.lane.b32.xlu0 %v2362_v24, %s2823_s4  ;;  %v2690_v23 = vld [vmem:[#allocation9] sm:$0xff]  }
0x14ca   :  { %v1699_v26 = vpack.c.bf16 %v1698_v4, %v1697_v21  ;;  %v2363_v28 = vpack.c.bf16 %v1698_v4, %v1698_v4 }
0x14cc   :  { %1707 = vrot.lane.b32.xlu1 %v2363_v28, %s2823_s4  ;;  %2617 = vmatpush3.bf16.msra.mxu0 %v1699_v26 }
0x14cd   :  { %2628 = vmatprep.subr.bf16.mxu0 %v2819_v0 }
0x14cf   :  { %2619 = vmatmul.mubr.msk.bf16.vlgmr.msra.gmra.mxu0 %vm102_vm1, %v3080_v27 }
0x14d0   :  { %2630 = vmatprep.mubr.msk.bf16.mxu0 %vm2820_vm0, %v2819_v0 }
0x153a   :  { %v1706_v29 = vpop.permute.xlu0 %1705 }
0x153b   :  { %1711 = vst.msk [vmem:[#allocation2 + $0x4] sm:$0xf] %vm219_vm4, %v1706_v29 }
0x153e   :  { %v1708_v30 = vpop.permute.xlu1 %1707 }
0x153f   :  { %1712 = vst.msk [vmem:[#allocation2 + $0xc] sm:$0xf] %vm219_vm4, %v1708_v30 }
0x158f   :  { %v1747_v31 = vpop.f32.mrf.mxu0 }
0x1590   :  { %v1754_v32 = vmul.f32 2.0, %v1747_v31 }
0x1591   :  { %v2620_v33 = vpop.f32.mrf.mxu0 }
0x1592   :  { %v1756_v34 = vsub.f32 %v1754_v32, %v1638_v8  ;;  %v2678_v8 = vld [vmem:[#allocation9 + $0x30] sm:$0xff]  }
0x1593   :  { %v1750_v35 = vpop.f32.mrf.mxu0 }
0x1594   :  { %v1755_v36 = vmul.f32 2.0, %v1750_v35  ;;  %v2364_v37 = vpack.c.bf16 %v1756_v34, %v1756_v34 }
0x1595   :  { %v2621_v38 = vpop.f32.mrf.mxu0 }
0x1596   :  { %v1757_v39 = vsub.f32 %v1755_v36, %v1639_v13  ;;  %1764 = vrot.lane.b32.xlu0 %v2364_v37, %s2824_s19  ;;  %v2683_v13 = vld [vmem:[#allocation9 + $0x58] sm:$0xff]   ;;  %v2137_v36 = vlaneseq }
0x1598   :  { %v1758_v40 = vpack.c.bf16 %v1757_v39, %v1756_v34  ;;  %v2365_v41 = vpack.c.bf16 %v1757_v39, %v1757_v39  ;;  %v2138_v38 = vand.u32 127, %v2137_v36 }
0x159a   :  { %1766 = vrot.lane.b32.xlu1 %v2365_v41, %s2824_s19  ;;  %2623 = vmatpush3.bf16.msra.mxu1 %v1758_v40  ;;  %v2293_v40 = vld [vmem:[%s3186_s5] ss:$0 sm:$0xff]  ;;  %vm2139_vm10 = vcmp.lt.s32.totalorder %v2138_v38, 4  ;;  %s2828_s5 = smov [#allocation11]  }
0x159b   :  { %2634 = vmatprep.subr.bf16.mxu1 %v2819_v0  ;;  %s2171_s28 = sshll.u32 %s2828_s5, 4  ;;  %s2172_s28 = int_to_ptr.vmem [resolvable:$true] %s2171_s28 }
0x159c   :  { %s2783_s29 = scalar_lea.vmem %s2172_s28, 256  ;;  %p2788_p7 = scmp.lt.s32.totalorder %s2172_s28, %s2172_s28 }
0x159d   :  { %2625 = vmatmul.mubr.msk.bf16.vlgmr.msra.gmra.mxu1 %vm102_vm1, %v3080_v27  ;;  %p2784_p6 = scmp.ne.s32.totalorder %s2172_s28, %s2783_s29  ;;  %p2789_p8 = scmp.lt.s32.totalorder %s2783_s29, %s2783_s29 }
0x159e   :  { %2636 = vmatprep.mubr.msk.bf16.mxu1 %vm2820_vm0, %v2819_v0 }
0x159f   :  { %p2790_p9 = por %p2789_p8, %p2788_p7 }
0x15a1   :  { %p2791_p10 = pnand %p2790_p9, %p2784_p6 }
0x1608   :  { %v1765_v42 = vpop.permute.xlu0 %1764 }
0x1609   :  { %1770 = vst.msk [vmem:[#allocation2 + $0x4] sm:$0xf] %vm279_vm5, %v1765_v42 }
0x160c   :  { %v1767_v43 = vpop.permute.xlu1 %1766 }
0x160d   :  { %1771 = vst.msk [vmem:[#allocation2 + $0xc] sm:$0xf] %vm279_vm5, %v1767_v43 }
0x165d   :  { %v1806_v44 = vpop.f32.mrf.mxu1 }
0x165e   :  { %v1813_v45 = vmul.f32 2.0, %v1806_v44 }
0x165f   :  { %v2626_v46 = vpop.f32.mrf.mxu1 }
0x1660   :  { %v3140_v47 = vsub.f32 %v1813_v45, %v1697_v21 }
0x1661   :  { %v1809_v48 = vpop.f32.mrf.mxu1 }
0x1662   :  { %v1814_v49 = vmul.f32 2.0, %v1809_v48  ;;  %v2366_v50 = vpack.c.bf16 %v3140_v47, %v3140_v47 }
0x1663   :  { %v2627_v51 = vpop.f32.mrf.mxu1 }
0x1664   :  { %v3144_v52 = vsub.f32 %v1814_v49, %v1698_v4  ;;  %1823 = vrot.lane.b32.xlu0 %v2366_v50, %s2815_s7 }
0x1666   :  { %v1817_v0 = vpack.c.bf16 %v3144_v52, %v3140_v47  ;;  %v2367_v53 = vpack.c.bf16 %v3144_v52, %v3144_v52 }
0x1668   :  { %1825 = vrot.lane.b32.xlu1 %v2367_v53, %s2815_s7  ;;  %2629 = vmatpush3.bf16.msra.mxu0 %v1817_v0 }
0x1669   :  { %2450 = vmatprep.subr.bf16.mxu0 %v2675_v5 }
0x166b   :  { %2631 = vmatmul.mubr.msk.bf16.vlgmr.msra.gmra.mxu0 %vm102_vm1, %v3080_v27 }
0x166c   :  { %2451 = vmatpush3.bf16.msra.mxu0 %v2676_v6 }
0x166d   :  { %2452 = vmatprep.subr.bf16.mxu0 %v2677_v7 }
0x1670   :  { %2453 = vmatpush3.bf16.msra.mxu0 %v2678_v8 }
0x1671   :  { %2454 = vmatprep.subr.bf16.mxu0 %v2679_v9 }
0x1674   :  { %2455 = vmatpush3.bf16.msra.mxu0 %v2680_v10 }
0x1675   :  { %2456 = vmatprep.subr.bf16.mxu0 %v2681_v11 }
0x1678   :  { %2457 = vmatpush3.bf16.msra.mxu0 %v2682_v12 }
0x1679   :  { %2458 = vmatprep.subr.bf16.mxu0 %v2683_v13 }
0x167c   :  { %2459 = vmatpush3.bf16.msra.mxu0 %v2684_v15 }
0x167d   :  { %2460 = vmatprep.subr.bf16.mxu0 %v2685_v16 }
0x1680   :  { %2461 = vmatpush3.bf16.msra.mxu0 %v2686_v17 }
0x1681   :  { %2462 = vmatprep.subr.bf16.mxu0 %v2687_v18 }
0x1684   :  { %2463 = vmatpush3.bf16.msra.mxu0 %v2688_v19 }
0x1685   :  { %2464 = vmatprep.subr.bf16.mxu0 %v2689_v20 }
0x1688   :  { %2465 = vmatpush3.bf16.msra.mxu0 %v2690_v23 }
0x16d6   :  { %v1824_v54 = vpop.permute.xlu0 %1823 }
0x16d7   :  { %1829 = vst.msk [vmem:[#allocation2 + $0x4] sm:$0xf] %vm339_vm6, %v1824_v54 }
0x16da   :  { %v1826_v55 = vpop.permute.xlu1 %1825 }
0x16db   :  { %1830 = vst.msk [vmem:[#allocation2 + $0xc] sm:$0xf] %vm339_vm6, %v1826_v55 }
0x172b   :  { %v1865_v56 = vpop.f32.mrf.mxu0 }
0x172c   :  { %v1872_v57 = vmul.f32 2.0, %v1865_v56 }
0x172d   :  { %v2632_v58 = vpop.f32.mrf.mxu0 }
0x172e   :  { %v1874_v59 = vsub.f32 %v1872_v57, %v1756_v34  ;;  %v2691_v34 = vld [vmem:[#allocation2] ss:$8 sps:$4 sm:$0xff]  }
0x172f   :  { %v1868_v60 = vpop.f32.mrf.mxu0 }
0x1730   :  { %v1873_v61 = vmul.f32 2.0, %v1868_v60  ;;  %v2368_v62 = vpack.c.bf16 %v1874_v59, %v1874_v59 }
0x1731   :  { %v2633_v63 = vpop.f32.mrf.mxu0 }
0x1732   :  { %v1875_v1 = vsub.f32 %v1873_v61, %v1757_v39  ;;  %1882 = vrot.lane.b32.xlu0 %v2368_v62, %s2825_s20 }
0x1734   :  { %v1876_v2 = vpack.c.bf16 %v1875_v1, %v1874_v59  ;;  %v2369_v3 = vpack.c.bf16 %v1875_v1, %v1875_v1 }
0x1736   :  { %1884 = vrot.lane.b32.xlu1 %v2369_v3, %s2825_s20  ;;  %2635 = vmatpush3.bf16.msra.mxu1 %v1876_v2 }
0x1739   :  { %2637 = vmatmul.mubr.msk.bf16.vlgmr.msra.gmra.mxu1 %vm102_vm1, %v3080_v27 }
0x17a4   :  { %v1883_v14 = vpop.permute.xlu0 %1882 }
0x17a5   :  { %1888 = vst.msk [vmem:[#allocation2 + $0x4] sm:$0xf] %vm399_vm7, %v1883_v14 }
0x17a8   :  { %v1885_v27 = vpop.permute.xlu1 %1884 }
0x17a9   :  { %1889 = vst.msk [vmem:[#allocation2 + $0xc] sm:$0xf] %vm399_vm7, %v1885_v27 }
0x17f9   :  { %v1924_v21 = vpop.f32.mrf.mxu1 }
0x17fa   :  { %v1931_v22 = vmul.f32 2.0, %v1924_v21 }
0x17fb   :  { %v2638_v24 = vpop.f32.mrf.mxu1 }
0x17fc   :  { %v1933_v25 = vsub.f32 %v1931_v22, %v3140_v47 }
0x17fd   :  { %v1927_v4 = vpop.f32.mrf.mxu1 }
0x17fe   :  { %v2370_v26 = vpack.c.bf16 %v1933_v25, %v1933_v25  ;;  %v1932_v28 = vmul.f32 2.0, %v1927_v4 }
0x17ff   :  { %v2639_v29 = vpop.f32.mrf.mxu1 }
0x1800   :  { %v1934_v30 = vsub.f32 %v1932_v28, %v3144_v52  ;;  %1941 = vrot.lane.b32.xlu0 %v2370_v26, %s2826_s21 }
0x1802   :  { %v2371_v31 = vpack.c.bf16 %v1934_v30, %v1934_v30 }
0x1804   :  { %1943 = vrot.lane.b32.xlu1 %v2371_v31, %s2826_s21 }
0x1872   :  { %v1942_v32 = vpop.permute.xlu0 %1941 }
0x1873   :  { %1947 = vst.msk [vmem:[#allocation2 + $0x4] sm:$0xf] %vm459_vm8, %v1942_v32 }
0x1876   :  { %v1944_v33 = vpop.permute.xlu1 %1943 }
0x1877   :  { %1948 = vst.msk [vmem:[#allocation2 + $0xc] sm:$0xf] %vm459_vm8, %v1944_v33 }
0x187e   :  { %v2693_v35 = vld [vmem:[#allocation2 + $0x4] ss:$8 sps:$4 sm:$0xff]  }
0x187f   :  { %2128 = vmatprep.mubr.bf16.mxu0 %v2693_v35 }
0x1880   :  { %2129 = vmatmul.mubr.bf16.vlgmr.msra.gmra.mxu0 %v2691_v34 }
0x1940   :  { %v2466_v37 = vpop.f32.mrf.mxu0 }
0x1942   :  { %v2467_v39 = vpop.f32.mrf.mxu0 }
0x1943   :  { %v2468_v41 = vadd.f32 %v2467_v39, %v2466_v37 }
0x1944   :  { %v2469_v42 = vpop.f32.mrf.mxu0 }
0x1945   :  { %v2131_v43 = vadd.f32 %v2468_v41, %v2293_v40 }
0x1946   :  { %v2470_v44 = vpop.f32.mrf.mxu0 }
0x1947   :  { %v2471_v45 = vadd.f32 %v2470_v44, %v2469_v42  ;;  %v2140_v46 = vsel %vm2139_vm10, %v2131_v43, -inf }
0x1948   :  { %2142 = vmax.xlane.f32.xlu0 %v2140_v46 }
0x1949   :  { %v2134_v47 = vadd.f32 %v2471_v45, %v2293_v40 }
0x194b   :  { %v2141_v48 = vsel %vm2139_vm10, %v2134_v47, -inf }
0x194c   :  { %2144 = vmax.xlane.f32.xlu1 %v2141_v48 }
0x19d1   :  { %v2143_v49 = vpop.xlane.xlu0 %2142 }
0x19d2   :  { %v2146_v50 = vsub.f32 %v2131_v43, %v2143_v49 }
0x19d4   :  { %v2148_v51 = vmul.f32 1.442695, %v2146_v50 }
0x19d5   :  { %v2145_v52 = vpop.xlane.xlu1 %2144 }
0x19d6   :  { %2694 = vpow2.f32 %v2148_v51  ;;  %v2147_v0 = vsub.f32 %v2134_v47, %v2145_v52 }
0x19d8   :  { %v2150_v53 = vmul.f32 1.442695, %v2147_v0 }
0x19da   :  { %2696 = vpow2.f32 %v2150_v53 }
0x19e3   :  { %v2695_v54 = vpop.eup %2694 }
0x19e4   :  { %v2152_v55 = vsel %vm2139_vm10, %v2695_v54, 0.0 }
0x19e5   :  { %2154 = vadd.xlane.f32.xlu0 %v2152_v55 }
0x19e7   :  { %v2697_v56 = vpop.eup %2696 }
0x19e8   :  { %v2153_v57 = vsel %vm2139_vm10, %v2697_v56, 0.0 }
0x19e9   :  { %2156 = vadd.xlane.f32.xlu0 %v2153_v57 }
0x1a6e   :  { %v2155_v58 = vpop.xlane.xlu0 %2154 }
0x1a6f   :  { %2698 = vlog2.f32 %v2155_v58 }
0x1a72   :  { %v2157_v59 = vpop.xlane.xlu0 %2156 }
0x1a73   :  { %2700 = vlog2.f32 %v2157_v59 }
0x1a7c   :  { %v2699_v60 = vpop.eup %2698 }
0x1a7d   :  { %v2159_v61 = vmul.f32 0.6931472, %v2699_v60 }
0x1a7f   :  { %v2162_v62 = vsub.f32 %v2146_v50, %v2159_v61 }
0x1a80   :  { %v2701_v63 = vpop.eup %2700 }
0x1a81   :  { %v2161_v1 = vmul.f32 0.6931472, %v2701_v63  ;;  %2164 = vst [vmem:[#allocation11] sm:$0xff] %v2162_v62 }
0x1a83   :  { %v2163_v2 = vsub.f32 %v2147_v0, %v2161_v1 }
0x1a85   :  { %2165 = vst [vmem:[#allocation11 + $0x8] sm:$0xff] %v2163_v2 }
0x1a86   :  { %2794 = shalt.err (!%p2791_p10)
}
0x1a87   :  { %2177 = dma.vmem_to_hbm [thread:$0]  %s2172_s28, 256, %s3187_s6, [#allocation5], %s2812_s24, %s2812_s24, %s2813_s25  }
0x1a88   :  { %2809 = dma.done.wait [#allocation5], 256  }
0x1a89   :  { %2810 = vsyncadd [#allocation5], 4294967040 }
0x1a8a   :  { %2181 = vsyncpa [#allocation4], 1 }
0x1a8b   :  { %2182 = vsyncpa [#allocation7], 1 }
0x1a8c   :  { %2183 = vsyncpa [#allocation10], 1 }
0x1a8d   :  { %2184 = vsyncpa [#allocation5], 1 }

</bundles_post_ra>
